<compile_context>
chip_gen: v6e
topology: v6e:2x2x1
jax: 0.10.0
libtpu: 0.0.40
codegen_flags: <defaults>
</compile_context>

<pallas_src>
import jax
import jax.numpy as jnp
from jax.experimental import pallas as pl
from jax.experimental.pallas import tpu as pltpu


# ----------------------------------------------------------------------------
# Kernel 1: fused gate_proj + up_proj (mixture adapters) + SiLU(gate) * up
# ----------------------------------------------------------------------------
def _gate_up_mixture_kernel(x_ref, wg_ref, wu_ref, qag_ref, qau_ref,
                            qbg_ref, qbu_ref, tkw_ref, h_ref,
                            accg_ref, accu_ref, tg_ref, tu_ref):
    """One (tb, tn) tile of SiLU(gate)*up; grid axis 2 is the in_f reduction."""
    k = pl.program_id(2)

    @pl.when(k == 0)
    def _init():
        accg_ref[...] = jnp.zeros_like(accg_ref)
        accu_ref[...] = jnp.zeros_like(accu_ref)
        tg_ref[...] = jnp.zeros_like(tg_ref)
        tu_ref[...] = jnp.zeros_like(tu_ref)

    x = x_ref[...]
    # Base paths (MXU), f32 accumulation in shared scratch.
    accg_ref[...] += jnp.dot(x, wg_ref[...], preferred_element_type=jnp.float32)
    accu_ref[...] += jnp.dot(x, wu_ref[...], preferred_element_type=jnp.float32)
    # Low-rank paths: one narrow matmul per projection for ALL experts.
    tg_ref[...] += jnp.dot(x, qag_ref[...], preferred_element_type=jnp.float32)
    tu_ref[...] += jnp.dot(x, qau_ref[...], preferred_element_type=jnp.float32)

    @pl.when(k == pl.num_programs(2) - 1)
    def _finalize():
        tkw = tkw_ref[...]
        # Mixture weights applied on the (tb, n_fused*rank) intermediate
        # (cheap), then one wide matmul up to out_f per projection.
        # qb_* already carry scaling_factor.
        tg = (tg_ref[...] * tkw).astype(qbg_ref.dtype)
        tu = (tu_ref[...] * tkw).astype(qbu_ref.dtype)
        g = accg_ref[...] + jnp.dot(tg, qbg_ref[...],
                                    preferred_element_type=jnp.float32)
        u = accu_ref[...] + jnp.dot(tu, qbu_ref[...],
                                    preferred_element_type=jnp.float32)
        h = (g * jax.nn.sigmoid(g)) * u      # SiLU(gate) * up
        h_ref[...] = h.astype(h_ref.dtype)


# ----------------------------------------------------------------------------
# Kernel 2: single FusedLinear 'mixture' (used for down_proj)
# ----------------------------------------------------------------------------
def _fused_mixture_kernel(x_ref, w_ref, qa_ref, qb_ref, tkw_ref, out_ref,
                          acc_ref, t_ref):
    """One (tb, tn) output tile; grid axis 2 is the in_f reduction."""
    k = pl.program_id(2)

    @pl.when(k == 0)
    def _init():
        acc_ref[...] = jnp.zeros_like(acc_ref)
        t_ref[...] = jnp.zeros_like(t_ref)

    x = x_ref[...]
    acc_ref[...] += jnp.dot(x, w_ref[...], preferred_element_type=jnp.float32)
    t_ref[...] += jnp.dot(x, qa_ref[...], preferred_element_type=jnp.float32)

    @pl.when(k == pl.num_programs(2) - 1)
    def _finalize():
        t_scaled = (t_ref[...] * tkw_ref[...]).astype(qb_ref.dtype)
        mix = jnp.dot(t_scaled, qb_ref[...], preferred_element_type=jnp.float32)
        out_ref[...] = (acc_ref[...] + mix).astype(out_ref.dtype)


# ----------------------------------------------------------------------------
# Operand prep + wrappers
# ----------------------------------------------------------------------------
def _prep_lowrank(qa_t, qb_t, scaling_factor, dtype):
    """Stack per-expert LoRA factors into wide matmul operands.

    qa_t: (n_fused, in_f, rank)   qb_t: (n_fused, rank, out_f)
    Returns (in_f, n_fused*rank) and (n_fused*rank, out_f); scaling folded.
    """
    n_fused, in_f, rank = qa_t.shape
    out_f = qb_t.shape[2]
    R = n_fused * rank
    qa_stacked = jnp.transpose(qa_t, (1, 0, 2)).reshape(in_f, R).astype(dtype)
    qb_stacked = (qb_t * scaling_factor.reshape(1, 1, out_f)
                  ).reshape(R, out_f).astype(dtype)
    return qa_stacked, qb_stacked


def _expand_topk(top_k_weights, rank):
    """(B, n_fused) -> (B, n_fused*rank), expert weight repeated per rank slot."""
    return jnp.repeat(top_k_weights.astype(jnp.float32), rank, axis=1)


def _vmem_limit(block_bytes):
    return int(min(max(3 * block_bytes, 32 * 1024 * 1024), 48 * 1024 * 1024))


def fused_linear_mixture(x, w_t, qa_t, qb_t, top_k_weights, scaling_factor,
                         *, tb=256, tn=512, tk=512):
    """FusedLinear 'mixture' forward.

    x:(B,in_f)  w_t:(in_f,out_f)  qa_t:(n_fused,in_f,rank)
    qb_t:(n_fused,rank,out_f)  top_k_weights:(B,n_fused)  scaling_factor:(out_f,)
    """
    B, in_f = x.shape
    out_f = w_t.shape[1]
    n_fused, _, rank = qa_t.shape
    R = n_fused * rank

    qa_s, qb_s = _prep_lowrank(qa_t, qb_t, scaling_factor, x.dtype)
    tkw = _expand_topk(top_k_weights, rank)

    tb = min(tb, B); tn = min(tn, out_f); tk = min(tk, in_f)
    assert B % tb == 0 and out_f % tn == 0 and in_f % tk == 0, (
        f"B={B}, in_f={in_f}, out_f={out_f} must divide tiles "
        f"tb={tb}, tk={tk}, tn={tn}")
    grid = (B // tb, out_f // tn, in_f // tk)

    it = x.dtype.itemsize
    blk = (2 * (tb * tk + tk * tn + tk * R + R * tn + tb * R) * it
           + 2 * tb * tn * it + (tb * tn + tb * R) * 4)
    flops = 2 * B * in_f * out_f + 2 * B * in_f * R + 2 * B * R * out_f
    bytes_acc = int((x.size + w_t.size + qa_s.size + qb_s.size + tkw.size
                     + B * out_f) * it)

    return pl.pallas_call(
        _fused_mixture_kernel,
        out_shape=jax.ShapeDtypeStruct((B, out_f), x.dtype),
        grid_spec=pltpu.PrefetchScalarGridSpec(
            num_scalar_prefetch=0,
            grid=grid,
            in_specs=[
                pl.BlockSpec((tb, tk), lambda i, j, k: (i, k)),   # x
                pl.BlockSpec((tk, tn), lambda i, j, k: (k, j)),   # W
                pl.BlockSpec((tk, R), lambda i, j, k: (k, 0)),    # qa stacked
                pl.BlockSpec((R, tn), lambda i, j, k: (0, j)),    # qb stacked*scale
                pl.BlockSpec((tb, R), lambda i, j, k: (i, 0)),    # expanded top-k
            ],
            out_specs=pl.BlockSpec((tb, tn), lambda i, j, k: (i, j)),
            scratch_shapes=[
                pltpu.VMEM((tb, tn), jnp.float32),   # base accumulator
                pltpu.VMEM((tb, R), jnp.float32),    # low-rank accumulator
            ],
        ),
        compiler_params=pltpu.CompilerParams(
            dimension_semantics=("parallel", "parallel", "arbitrary"),
            vmem_limit_bytes=_vmem_limit(blk),
        ),
        cost_estimate=pl.CostEstimate(flops=flops, transcendentals=0,
                                      bytes_accessed=bytes_acc),
    )(x, w_t, qa_s, qb_s, tkw)


def fused_mlp_mixture(x, top_k_weights, params, *, tb=256, tn=512, tk=512):
    """FusedMLP forward (adapter_type='mixture', act = SiLU).

    params keys: mask_up_w (H,n_fused); wg_t,wu_t (H,I); wd_t (I,H);
    qa_g,qa_u (n_fused,H,rank); qb_g,qb_u (n_fused,rank,I);
    qa_d (n_fused,I,rank); qb_d (n_fused,rank,H);
    scale_g,scale_u (I,); scale_d (H,).
    """
    B, H = x.shape
    I = params['wg_t'].shape[1]
    n_fused = top_k_weights.shape[1]
    rank = params['qa_g'].shape[2]
    R = n_fused * rank

    # x' = x + mask_up_proj(top_k_weights)  (tiny (B,n_fused)@(n_fused,H) matmul)
    x_in = (x + top_k_weights @ params['mask_up_w'].T).astype(x.dtype)

    qag, qbg = _prep_lowrank(params['qa_g'], params['qb_g'], params['scale_g'],
                             x.dtype)
    qau, qbu = _prep_lowrank(params['qa_u'], params['qb_u'], params['scale_u'],
                             x.dtype)
    tkw = _expand_topk(top_k_weights, rank)

    tb1 = min(tb, B); tn1 = min(tn, I); tk1 = min(tk, H)
    assert B % tb1 == 0 and I % tn1 == 0 and H % tk1 == 0, (
        f"B={B}, H={H}, I={I} must divide tiles tb={tb1}, tk={tk1}, tn={tn1}")
    grid = (B // tb1, I // tn1, H // tk1)

    it = x.dtype.itemsize
    blk = (2 * (tb1 * tk1 + 2 * tk1 * tn1 + 2 * tk1 * R + 2 * R * tn1
                + tb1 * R) * it
           + 2 * tb1 * tn1 * it + (2 * tb1 * tn1 + 2 * tb1 * R) * 4)
    flops = 4 * B * H * I + 4 * B * H * R + 4 * B * R * I + 4 * B * I
    bytes_acc = int((x_in.size + 2 * H * I + 2 * (qag.size + qbg.size)
                     + tkw.size + B * I) * it)

    # Stage 1: h = SiLU(gate_proj(x')) * up_proj(x')   — one fused kernel.
    h = pl.pallas_call(
        _gate_up_mixture_kernel,
        out_shape=jax.ShapeDtypeStruct((B, I), x.dtype),
        grid_spec=pltpu.PrefetchScalarGridSpec(
            num_scalar_prefetch=0,
            grid=grid,
            in_specs=[
                pl.BlockSpec((tb1, tk1), lambda i, j, k: (i, k)),   # x'
                pl.BlockSpec((tk1, tn1), lambda i, j, k: (k, j)),   # Wg
                pl.BlockSpec((tk1, tn1), lambda i, j, k: (k, j)),   # Wu
                pl.BlockSpec((tk1, R), lambda i, j, k: (k, 0)),     # qa_g stacked
                pl.BlockSpec((tk1, R), lambda i, j, k: (k, 0)),     # qa_u stacked
                pl.BlockSpec((R, tn1), lambda i, j, k: (0, j)),     # qb_g * scale
                pl.BlockSpec((R, tn1), lambda i, j, k: (0, j)),     # qb_u * scale
                pl.BlockSpec((tb1, R), lambda i, j, k: (i, 0)),     # expanded top-k
            ],
            out_specs=pl.BlockSpec((tb1, tn1), lambda i, j, k: (i, j)),
            scratch_shapes=[
                pltpu.VMEM((tb1, tn1), jnp.float32),   # gate accumulator
                pltpu.VMEM((tb1, tn1), jnp.float32),   # up accumulator
                pltpu.VMEM((tb1, R), jnp.float32),     # gate low-rank acc
                pltpu.VMEM((tb1, R), jnp.float32),     # up low-rank acc
            ],
        ),
        compiler_params=pltpu.CompilerParams(
            dimension_semantics=("parallel", "parallel", "arbitrary"),
            vmem_limit_bytes=_vmem_limit(blk),
        ),
        cost_estimate=pl.CostEstimate(flops=flops, transcendentals=B * I,
                                      bytes_accessed=bytes_acc),
    )(x_in, params['wg_t'], params['wu_t'], qag, qau, qbg, qbu, tkw)

    # Stage 2: down_proj (FusedLinear 'mixture').
    return fused_linear_mixture(h, params['wd_t'], params['qa_d'],
                                params['qb_d'], top_k_weights,
                                params['scale_d'], tb=tb, tn=tn, tk=tk)


# ----------------------------------------------------------------------------
# Pure-JAX references
# ----------------------------------------------------------------------------
def fused_linear_mixture_ref(x, w_t, qa_t, qb_t, top_k_weights, scaling_factor):
    base = x @ w_t
    t = jnp.einsum('bh,khr->bkr', x, qa_t)
    y = jnp.einsum('bkr,krh->bkh', t, qb_t)
    mix = jnp.sum(y * top_k_weights[:, :, None], axis=1)
    return base + scaling_factor[None] * mix


def fused_mlp_ref(x, top_k_weights, params):
    x_in = x + top_k_weights @ params['mask_up_w'].T
    g = fused_linear_mixture_ref(x_in, params['wg_t'], params['qa_g'],
                                 params['qb_g'], top_k_weights,
                                 params['scale_g'])
    u = fused_linear_mixture_ref(x_in, params['wu_t'], params['qa_u'],
                                 params['qb_u'], top_k_weights,
                                 params['scale_u'])
    h = jax.nn.silu(g) * u
    return fused_linear_mixture_ref(h, params['wd_t'], params['qa_d'],
                                    params['qb_d'], top_k_weights,
                                    params['scale_d'])


if __name__ == "__main__":
    B, hidden, intermediate, rank, n_fused = 128, 256, 512, 8, 4

    key = jax.random.PRNGKey(0)
    ks = jax.random.split(key, 16)

    x = jax.random.normal(ks[0], (B, hidden), jnp.float32)
    top_k_weights = jax.nn.softmax(
        jax.random.normal(ks[1], (B, n_fused), jnp.float32), axis=-1)

    # nn.Linear(in, out).weight is (out, in); pre-transposed forms stored here.
    params = {
        'mask_up_w': jax.random.normal(ks[2], (hidden, n_fused), jnp.float32) * 0.02,
        'wg_t': jax.random.normal(ks[3], (hidden, intermediate), jnp.float32) * 0.02,
        'wu_t': jax.random.normal(ks[4], (hidden, intermediate), jnp.float32) * 0.02,
        'wd_t': jax.random.normal(ks[5], (intermediate, hidden), jnp.float32) * 0.02,
        # Module __init__ zeros qa/qb; use non-trivial values so the adapter
        # path is meaningfully exercised relative to the tolerance.
        'qa_g': jax.random.normal(ks[6], (n_fused, hidden, rank), jnp.float32) * 0.1,
        'qb_g': jax.random.normal(ks[7], (n_fused, rank, intermediate), jnp.float32) * 0.1,
        'qa_u': jax.random.normal(ks[8], (n_fused, hidden, rank), jnp.float32) * 0.1,
        'qb_u': jax.random.normal(ks[9], (n_fused, rank, intermediate), jnp.float32) * 0.1,
        'qa_d': jax.random.normal(ks[10], (n_fused, intermediate, rank), jnp.float32) * 0.1,
        'qb_d': jax.random.normal(ks[11], (n_fused, rank, hidden), jnp.float32) * 0.1,
        # Varying scaling_factor so the fold-into-qb transform is validated.
        'scale_g': 0.5 + jax.random.uniform(ks[12], (intermediate,), jnp.float32),
        'scale_u': 0.5 + jax.random.uniform(ks[13], (intermediate,), jnp.float32),
        'scale_d': 0.5 + jax.random.uniform(ks[14], (hidden,), jnp.float32),
    }

    # Small tiles so every grid is non-trivial (gate/up grid (2,4,2), down (2,2,4)).
    out = fused_mlp_mixture(x, top_k_weights, params, tb=64, tn=128, tk=128)
    out = jax.block_until_ready(out)

    ref = fused_mlp_ref(x, top_k_weights, params)
    assert out.shape == ref.shape
    max_diff = jnp.max(jnp.abs(out - ref))
    # Tolerance allows for tiled/MXU accumulation-order differences across the
    # two chained stages; structural errors would be O(0.1+) at these scales.
    assert jnp.allclose(out, ref, atol=5e-3, rtol=5e-3), (
        f"mismatch vs reference: max abs diff {max_diff}")

    print("KERNEL_OK")
</pallas_src>

<mosaic_0001>
module attributes {stable_mosaic.version = 11 : i64} {
  func.func @_gate_up_mixture_kernel(%arg0: i32, %arg1: i32, %arg2: i32, %arg3: memref<64x128xf32, #tpu.memory_space<vmem>>, %arg4: memref<128x128xf32, #tpu.memory_space<vmem>>, %arg5: memref<128x128xf32, #tpu.memory_space<vmem>>, %arg6: memref<128x32xf32, #tpu.memory_space<vmem>>, %arg7: memref<128x32xf32, #tpu.memory_space<vmem>>, %arg8: memref<32x128xf32, #tpu.memory_space<vmem>>, %arg9: memref<32x128xf32, #tpu.memory_space<vmem>>, %arg10: memref<64x32xf32, #tpu.memory_space<vmem>>, %arg11: memref<64x128xf32, #tpu.memory_space<vmem>>, %arg12: memref<64x128xf32, #tpu.memory_space<vmem>>, %arg13: memref<64x128xf32, #tpu.memory_space<vmem>>, %arg14: memref<64x32xf32, #tpu.memory_space<vmem>>, %arg15: memref<64x32xf32, #tpu.memory_space<vmem>>) attributes {dimension_semantics = [#tpu.dimension_semantics<parallel>, #tpu.dimension_semantics<parallel>, #tpu.dimension_semantics<arbitrary>], iteration_bounds = array<i64: 2, 4, 2>, scalar_prefetch = 0 : i64, scratch_operands = 4 : i64, tpu.core_type = #tpu.core_type<tc>, window_params = [{transform_indices = @transform_0, window_bounds = array<i64: 64, 128>}, {transform_indices = @transform_1, window_bounds = array<i64: 128, 128>}, {transform_indices = @transform_2, window_bounds = array<i64: 128, 128>}, {transform_indices = @transform_3, window_bounds = array<i64: 128, 32>}, {transform_indices = @transform_4, window_bounds = array<i64: 128, 32>}, {transform_indices = @transform_5, window_bounds = array<i64: 32, 128>}, {transform_indices = @transform_6, window_bounds = array<i64: 32, 128>}, {transform_indices = @transform_7, window_bounds = array<i64: 64, 32>}, {transform_indices = @transform_8, window_bounds = array<i64: 64, 128>}]} {
    %c0_i32 = arith.constant 0 : i32
    %0 = arith.cmpi eq, %arg2, %c0_i32 : i32
    %1 = arith.extui %0 : i1 to i32
    %c0_i32_0 = arith.constant 0 : i32
    %2 = arith.cmpi ne, %1, %c0_i32_0 : i32
    scf.if %2 {
      %cst_30 = arith.constant 0.000000e+00 : f32
      %27 = vector.broadcast %cst_30 : f32 to vector<64x128xf32>
      %c0_31 = arith.constant 0 : index
      %c0_32 = arith.constant 0 : index
      %28 = vector.load %arg12[%c0_31, %c0_32] : memref<64x128xf32, #tpu.memory_space<vmem>>, vector<64x128xf32>
      tpu.vector_store %arg12[%c0_31, %c0_32], %27 {strides = array<i32>} : memref<64x128xf32, #tpu.memory_space<vmem>>, vector<64x128xf32>,
      %cst_33 = arith.constant 0.000000e+00 : f32
      %29 = vector.broadcast %cst_33 : f32 to vector<64x128xf32>
      %c0_34 = arith.constant 0 : index
      %c0_35 = arith.constant 0 : index
      %30 = vector.load %arg13[%c0_34, %c0_35] : memref<64x128xf32, #tpu.memory_space<vmem>>, vector<64x128xf32>
      tpu.vector_store %arg13[%c0_34, %c0_35], %29 {strides = array<i32>} : memref<64x128xf32, #tpu.memory_space<vmem>>, vector<64x128xf32>,
      %cst_36 = arith.constant 0.000000e+00 : f32
      %31 = vector.broadcast %cst_36 : f32 to vector<64x32xf32>
      %c0_37 = arith.constant 0 : index
      %c0_38 = arith.constant 0 : index
      %32 = vector.load %arg14[%c0_37, %c0_38] : memref<64x32xf32, #tpu.memory_space<vmem>>, vector<64x32xf32>
      tpu.vector_store %arg14[%c0_37, %c0_38], %31 {strides = array<i32>} : memref<64x32xf32, #tpu.memory_space<vmem>>, vector<64x32xf32>,
      %cst_39 = arith.constant 0.000000e+00 : f32
      %33 = vector.broadcast %cst_39 : f32 to vector<64x32xf32>
      %c0_40 = arith.constant 0 : index
      %c0_41 = arith.constant 0 : index
      %34 = vector.load %arg15[%c0_40, %c0_41] : memref<64x32xf32, #tpu.memory_space<vmem>>, vector<64x32xf32>
      tpu.vector_store %arg15[%c0_40, %c0_41], %33 {strides = array<i32>} : memref<64x32xf32, #tpu.memory_space<vmem>>, vector<64x32xf32>,
    } else {
    }
    %c0 = arith.constant 0 : index
    %c0_1 = arith.constant 0 : index
    %3 = vector.load %arg3[%c0, %c0_1] : memref<64x128xf32, #tpu.memory_space<vmem>>, vector<64x128xf32>
    %c0_2 = arith.constant 0 : index
    %c0_3 = arith.constant 0 : index
    %4 = vector.load %arg12[%c0_2, %c0_3] : memref<64x128xf32, #tpu.memory_space<vmem>>, vector<64x128xf32>
    %c0_4 = arith.constant 0 : index
    %c0_5 = arith.constant 0 : index
    %5 = vector.load %arg4[%c0_4, %c0_5] : memref<128x128xf32, #tpu.memory_space<vmem>>, vector<128x128xf32>
    %cst = arith.constant dense<0.000000e+00> : vector<64x128xf32>
    %6 = tpu.matmul %3, %5, %cst {dimension_numbers = #tpu.dot_dimension_numbers<[1], [0], [0], [1], [0, 0, 1, 1], [], []>} : vector<64x128xf32>, vector<128x128xf32>, vector<64x128xf32> -> vector<64x128xf32>
    %7 = arith.addf %4, %6 : vector<64x128xf32>
    %c0_6 = arith.constant 0 : index
    %c0_7 = arith.constant 0 : index
    %8 = vector.load %arg12[%c0_6, %c0_7] : memref<64x128xf32, #tpu.memory_space<vmem>>, vector<64x128xf32>
    tpu.vector_store %arg12[%c0_6, %c0_7], %7 {strides = array<i32>} : memref<64x128xf32, #tpu.memory_space<vmem>>, vector<64x128xf32>,
    %c0_8 = arith.constant 0 : index
    %c0_9 = arith.constant 0 : index
    %9 = vector.load %arg13[%c0_8, %c0_9] : memref<64x128xf32, #tpu.memory_space<vmem>>, vector<64x128xf32>
    %c0_10 = arith.constant 0 : index
    %c0_11 = arith.constant 0 : index
    %10 = vector.load %arg5[%c0_10, %c0_11] : memref<128x128xf32, #tpu.memory_space<vmem>>, vector<128x128xf32>
    %cst_12 = arith.constant dense<0.000000e+00> : vector<64x128xf32>
    %11 = tpu.matmul %3, %10, %cst_12 {dimension_numbers = #tpu.dot_dimension_numbers<[1], [0], [0], [1], [0, 0, 1, 1], [], []>} : vector<64x128xf32>, vector<128x128xf32>, vector<64x128xf32> -> vector<64x128xf32>
    %12 = arith.addf %9, %11 : vector<64x128xf32>
    %c0_13 = arith.constant 0 : index
    %c0_14 = arith.constant 0 : index
    %13 = vector.load %arg13[%c0_13, %c0_14] : memref<64x128xf32, #tpu.memory_space<vmem>>, vector<64x128xf32>
    tpu.vector_store %arg13[%c0_13, %c0_14], %12 {strides = array<i32>} : memref<64x128xf32, #tpu.memory_space<vmem>>, vector<64x128xf32>,
    %c0_15 = arith.constant 0 : index
    %c0_16 = arith.constant 0 : index
    %14 = vector.load %arg14[%c0_15, %c0_16] : memref<64x32xf32, #tpu.memory_space<vmem>>, vector<64x32xf32>
    %c0_17 = arith.constant 0 : index
    %c0_18 = arith.constant 0 : index
    %15 = vector.load %arg6[%c0_17, %c0_18] : memref<128x32xf32, #tpu.memory_space<vmem>>, vector<128x32xf32>
    %cst_19 = arith.constant dense<0.000000e+00> : vector<64x32xf32>
    %16 = tpu.matmul %3, %15, %cst_19 {dimension_numbers = #tpu.dot_dimension_numbers<[1], [0], [0], [1], [0, 0, 1, 1], [], []>} : vector<64x128xf32>, vector<128x32xf32>, vector<64x32xf32> -> vector<64x32xf32>
    %17 = arith.addf %14, %16 : vector<64x32xf32>
    %c0_20 = arith.constant 0 : index
    %c0_21 = arith.constant 0 : index
    %18 = vector.load %arg14[%c0_20, %c0_21] : memref<64x32xf32, #tpu.memory_space<vmem>>, vector<64x32xf32>
    tpu.vector_store %arg14[%c0_20, %c0_21], %17 {strides = array<i32>} : memref<64x32xf32, #tpu.memory_space<vmem>>, vector<64x32xf32>,
    %c0_22 = arith.constant 0 : index
    %c0_23 = arith.constant 0 : index
    %19 = vector.load %arg15[%c0_22, %c0_23] : memref<64x32xf32, #tpu.memory_space<vmem>>, vector<64x32xf32>
    %c0_24 = arith.constant 0 : index
    %c0_25 = arith.constant 0 : index
    %20 = vector.load %arg7[%c0_24, %c0_25] : memref<128x32xf32, #tpu.memory_space<vmem>>, vector<128x32xf32>
    %cst_26 = arith.constant dense<0.000000e+00> : vector<64x32xf32>
    %21 = tpu.matmul %3, %20, %cst_26 {dimension_numbers = #tpu.dot_dimension_numbers<[1], [0], [0], [1], [0, 0, 1, 1], [], []>} : vector<64x128xf32>, vector<128x32xf32>, vector<64x32xf32> -> vector<64x32xf32>
    %22 = arith.addf %19, %21 : vector<64x32xf32>
    %c0_27 = arith.constant 0 : index
    %c0_28 = arith.constant 0 : index
    %23 = vector.load %arg15[%c0_27, %c0_28] : memref<64x32xf32, #tpu.memory_space<vmem>>, vector<64x32xf32>
    tpu.vector_store %arg15[%c0_27, %c0_28], %22 {strides = array<i32>} : memref<64x32xf32, #tpu.memory_space<vmem>>, vector<64x32xf32>,
    %c1_i32 = arith.constant 1 : i32
    %24 = arith.cmpi eq, %arg2, %c1_i32 : i32
    %25 = arith.extui %24 : i1 to i32
    %c0_i32_29 = arith.constant 0 : i32
    %26 = arith.cmpi ne, %25, %c0_i32_29 : i32
    scf.if %26 {
      %c0_30 = arith.constant 0 : index
      %c0_31 = arith.constant 0 : index
      %27 = vector.load %arg10[%c0_30, %c0_31] : memref<64x32xf32, #tpu.memory_space<vmem>>, vector<64x32xf32>
      %c0_32 = arith.constant 0 : index
      %c0_33 = arith.constant 0 : index
      %28 = vector.load %arg14[%c0_32, %c0_33] : memref<64x32xf32, #tpu.memory_space<vmem>>, vector<64x32xf32>
      %29 = arith.mulf %28, %27 : vector<64x32xf32>
      %c0_34 = arith.constant 0 : index
      %c0_35 = arith.constant 0 : index
      %30 = vector.load %arg15[%c0_34, %c0_35] : memref<64x32xf32, #tpu.memory_space<vmem>>, vector<64x32xf32>
      %31 = arith.mulf %30, %27 : vector<64x32xf32>
      %c0_36 = arith.constant 0 : index
      %c0_37 = arith.constant 0 : index
      %32 = vector.load %arg12[%c0_36, %c0_37] : memref<64x128xf32, #tpu.memory_space<vmem>>, vector<64x128xf32>
      %c0_38 = arith.constant 0 : index
      %c0_39 = arith.constant 0 : index
      %33 = vector.load %arg8[%c0_38, %c0_39] : memref<32x128xf32, #tpu.memory_space<vmem>>, vector<32x128xf32>
      %cst_40 = arith.constant dense<0.000000e+00> : vector<64x128xf32>
      %34 = tpu.matmul %29, %33, %cst_40 {dimension_numbers = #tpu.dot_dimension_numbers<[1], [0], [0], [1], [0, 0, 1, 1], [], []>} : vector<64x32xf32>, vector<32x128xf32>, vector<64x128xf32> -> vector<64x128xf32>
      %35 = arith.addf %32, %34 : vector<64x128xf32>
      %c0_41 = arith.constant 0 : index
      %c0_42 = arith.constant 0 : index
      %36 = vector.load %arg13[%c0_41, %c0_42] : memref<64x128xf32, #tpu.memory_space<vmem>>, vector<64x128xf32>
      %c0_43 = arith.constant 0 : index
      %c0_44 = arith.constant 0 : index
      %37 = vector.load %arg9[%c0_43, %c0_44] : memref<32x128xf32, #tpu.memory_space<vmem>>, vector<32x128xf32>
      %cst_45 = arith.constant dense<0.000000e+00> : vector<64x128xf32>
      %38 = tpu.matmul %31, %37, %cst_45 {dimension_numbers = #tpu.dot_dimension_numbers<[1], [0], [0], [1], [0, 0, 1, 1], [], []>} : vector<64x32xf32>, vector<32x128xf32>, vector<64x128xf32> -> vector<64x128xf32>
      %39 = arith.addf %36, %38 : vector<64x128xf32>
      %40 = arith.negf %35 : vector<64x128xf32>
      %41 = math.exp %40 : vector<64x128xf32>
      %cst_46 = arith.constant 1.000000e+00 : f32
      %42 = vector.broadcast %cst_46 : f32 to vector<64x128xf32>
      %43 = arith.addf %42, %41 : vector<64x128xf32>
      %44 = arith.divf %42, %43 : vector<64x128xf32>
      %45 = arith.mulf %35, %44 : vector<64x128xf32>
      %46 = arith.mulf %45, %39 : vector<64x128xf32>
      %c0_47 = arith.constant 0 : index
      %c0_48 = arith.constant 0 : index
      %47 = vector.load %arg11[%c0_47, %c0_48] : memref<64x128xf32, #tpu.memory_space<vmem>>, vector<64x128xf32>
      tpu.vector_store %arg11[%c0_47, %c0_48], %46 {strides = array<i32>} : memref<64x128xf32, #tpu.memory_space<vmem>>, vector<64x128xf32>,
    } else {
    }
    return
  }
  func.func @transform_0(%arg0: i32, %arg1: i32, %arg2: i32) -> (i32, i32) {
    %c0_i32 = arith.constant 0 : i32
    return %arg0, %arg2 : i32, i32
  }
  func.func @transform_1(%arg0: i32, %arg1: i32, %arg2: i32) -> (i32, i32) {
    %c0_i32 = arith.constant 0 : i32
    return %arg2, %arg1 : i32, i32
  }
  func.func @transform_2(%arg0: i32, %arg1: i32, %arg2: i32) -> (i32, i32) {
    %c0_i32 = arith.constant 0 : i32
    return %arg2, %arg1 : i32, i32
  }
  func.func @transform_3(%arg0: i32, %arg1: i32, %arg2: i32) -> (i32, i32) {
    %c0_i32 = arith.constant 0 : i32
    %c0_i32_0 = arith.constant 0 : i32
    return %arg2, %c0_i32 : i32, i32
  }
  func.func @transform_4(%arg0: i32, %arg1: i32, %arg2: i32) -> (i32, i32) {
    %c0_i32 = arith.constant 0 : i32
    %c0_i32_0 = arith.constant 0 : i32
    return %arg2, %c0_i32 : i32, i32
  }
  func.func @transform_5(%arg0: i32, %arg1: i32, %arg2: i32) -> (i32, i32) {
    %c0_i32 = arith.constant 0 : i32
    %c0_i32_0 = arith.constant 0 : i32
    return %c0_i32, %arg1 : i32, i32
  }
  func.func @transform_6(%arg0: i32, %arg1: i32, %arg2: i32) -> (i32, i32) {
    %c0_i32 = arith.constant 0 : i32
    %c0_i32_0 = arith.constant 0 : i32
    return %c0_i32, %arg1 : i32, i32
  }
  func.func @transform_7(%arg0: i32, %arg1: i32, %arg2: i32) -> (i32, i32) {
    %c0_i32 = arith.constant 0 : i32
    %c0_i32_0 = arith.constant 0 : i32
    return %arg0, %c0_i32 : i32, i32
  }
  func.func @transform_8(%arg0: i32, %arg1: i32, %arg2: i32) -> (i32, i32) {
    %c0_i32 = arith.constant 0 : i32
    return %arg0, %arg1 : i32, i32
  }
}

</mosaic_0001>

<bundles_post_ra>
// kernel: tpu_custom_call.1
= control target key start
LH: loop header
LB: loop body
LE: loop exit
PB: predicated region body
PF: predicated region fallthrough
CT: control target
= control target key end

     0   :  { %s3385_s0 = inlined_call_operand.vmem [shape: f32[128,256], index: 0, kind: input, shape index: {}]   ;;  %s3386_s1 = inlined_call_operand.hbm [shape: f32[256,512], index: 1, kind: input, shape index: {}]   ;;  %s3387_s2 = inlined_call_operand.hbm [shape: f32[256,512], index: 2, kind: input, shape index: {}]   ;;  %s3388_s3 = inlined_call_operand.vmem [shape: f32[256,32], index: 3, kind: input, shape index: {}]   ;;  %s3389_s4 = inlined_call_operand.vmem [shape: f32[256,32], index: 4, kind: input, shape index: {}]   ;;  %s3390_s5 = inlined_call_operand.vmem [shape: f32[32,512], index: 5, kind: input, shape index: {}]   ;;  %s3391_s6 = inlined_call_operand.vmem [shape: f32[32,512], index: 6, kind: input, shape index: {}]   ;;  %s3392_s7 = inlined_call_operand.vmem [shape: f32[128,32], index: 7, kind: input, shape index: {}]   ;;  %s3393_s8 = inlined_call_operand.hbm [shape: f32[128,512], index: 8, kind: output, shape index: {}]  }
   0x1   :  { %3410 = sst [smem:[#allocation37_spill]] %s3385_s0 }
   0x2   :  { %3411 = sst [smem:[#allocation38_spill]] %s3386_s1 }
   0x3   :  { %3412 = sst [smem:[#allocation39_spill]] %s3387_s2 }
   0x4   :  { %3413 = sst [smem:[#allocation40_spill]] %s3388_s3 }
   0x5   :  { %3414 = sst [smem:[#allocation41_spill]] %s3389_s4 }
   0x6   :  { %3415 = sst [smem:[#allocation42_spill]] %s3392_s7 }
   0x7   :  { %3416 = sst [smem:[#allocation43_spill]] %s3393_s8 }
   0x8   :  { %13 = vsyncpa [#allocation8], 0 }
   0x9   :  { %15 = vsyncpa [#allocation8 + $0x1], 0 }
   0xa   :  { %16 = vsyncpa [#allocation11], 0 }
   0xb   :  { %18 = vsyncpa [#allocation11 + $0x1], 0 }
   0xc   :  { %19 = vsyncpa [#allocation9], 0 }
   0xd   :  { %21 = vsyncpa [#allocation9 + $0x1], 0  ;;  %s2824_s27 = smov 0   ;;  %s2826_s28 = smov 0  }
   0xe   :  { %s2828_s29 = smov 0   ;;  %s2830_s30 = smov 0  }
   0xf   :  { %s2832_s9 = smov 0   ;;  %s2834_s10 = smov 0  }
  0x10   :  { %s2836_s11 = smov 0   ;;  %s2838_s12 = smov 0  }
  0x11   :  { %s2840_s13 = smov 0   ;;  %s2842_s14 = smov 0  }
  0x12   :  { %s2844_s15 = smov 0   ;;  %s2846_s16 = smov 0  }
  0x13   :  { %s2848_s17 = smov 0   ;;  %s2850_s18 = smov 0  }
  0x14   :  { %s2852_s19 = smov 0   ;;  %s2854_s20 = smov 0  }
  0x15   :  { %s2856_s21 = smov 0  }
  0x16 LB: > { %3417 = sst [smem:[#allocation18_spill]] %s2703_s27  ;;  %s39_s24 = sadd.s32 1, %s2755_s18  ;;  %s2767_s21 = sphi %s2856_s21, %s27_s21   ;;  %s2763_s20 = sphi %s2854_s20, %s3475_s20   ;;  %s2759_s19 = sphi %s2852_s19, %s3483_s19   ;;  %s2755_s18 = sphi %s2850_s18, %s3473_s18   ;;  %s2751_s17 = sphi %s2848_s17, %s3472_s17   ;;  %s2747_s16 = sphi %s2846_s16, %s3482_s16   ;;  %s2743_s15 = sphi %s2844_s15, %s3471_s15   ;;  %s2739_s14 = sphi %s2842_s14, %s3470_s14   ;;  %s2735_s13 = sphi %s2840_s13, %s3469_s13   ;;  %s2731_s12 = sphi %s2838_s12, %s3468_s12   ;;  %s2727_s11 = sphi %s2836_s11, %s3467_s11   ;;  %s2723_s10 = sphi %s2834_s10, %s3481_s10   ;;  %s2719_s9 = sphi %s2832_s9, %s3480_s9   ;;  %s2715_s30 = sphi %s2830_s30, %s3479_s30   ;;  %s2711_s29 = sphi %s2828_s29, %s3464_s29   ;;  %s2707_s28 = sphi %s2826_s28, %s3477_s28   ;;  %s2703_s27 = sphi %s2824_s27, %s3476_s27  }
  0x17   : > { %3418 = sst [smem:[#allocation19_spill]] %s2711_s29  ;;  %s42_s25 = sadd.s32 1, %s2759_s19 }
  0x18   : > { %3419 = sst [smem:[#allocation20_spill]] %s2727_s11  ;;  %p40_p0 = scmp.ge.s32.totalorder %s39_s24, 2 }
  0x19   : > { %3420 = sst [smem:[#allocation21_spill]] %s2731_s12  ;;  %s46_s26 = sadd.s32 1, %s2763_s20 }
  0x1a   : > { %3421 = sst [smem:[#allocation22_spill]] %s2739_s14  ;;  %s55_s8 = sadd.s32 1, %s2739_s14 }
  0x1b   : > { %3422 = sst [smem:[#allocation23_spill]] %s2743_s15  ;;  %p62_p1 = scmp.ne.s32.totalorder %s2739_s14, %s2735_s13 }
  0x1c   : > { %3423 = sst [smem:[#allocation24_spill]] %s2747_s16  ;;  %s3485_s24 = smov (%p40_p0, %s39_s24), 0 }
  0x1d   : > { %3424 = sst [smem:[#allocation25_spill]] %s2751_s17  ;;  %s3487_s25 = smov (!%p40_p0, %s42_s25), %s2759_s19 }
  0x1e   : > { %3425 = sst [smem:[#allocation26_spill]] %s2755_s18  ;;  %s51_s16 = ssub.s32 %s2755_s18, %s3485_s24 }
  0x1f   : > { %3426 = sst [smem:[#allocation27_spill]] %s2763_s20  ;;  %p63_p2 = scmp.eq.s32.totalorder %s2767_s21, 0 }
  0x20   : > { %3427 = sst [smem:[#allocation28_spill]] %s3485_s24  ;;  %p44_p3 = scmp.ge.s32.totalorder %s3487_s25, 4 }
  0x21   : > { %s83_s23 = sadd.s32 1, %s2731_s12  ;;  %p2926_p4 = por %p63_p2, %p62_p1 }
  0x22   : > { %p90_p5 = scmp.ne.s32.totalorder %s2731_s12, %s2727_s11  ;;  %s3489_s25 = smov (%p44_p3, %s3487_s25), 0 }
  0x23   : > { %3429 = sst [smem:[#allocation29_spill]] %s3489_s25  ;;  %s3491_s26 = smov (!%p44_p3, %s46_s26), %s2763_s20 }
  0x24   : > { %s79_s7 = ssub.s32 %s2759_s19, %s3489_s25  ;;  %p2939_p6 = por %p90_p5, %p63_p2 }
  0x25   : > { %p48_p7 = scmp.ge.s32.totalorder %s3491_s26, 2  ;;  %s80_s4 = sor.u32 %s79_s7, %s51_s16 }
  0x26   : > { %p81_p8 = scmp.eq.s32.totalorder %s80_s4, 0  ;;  %p96_p9 = scmp.ne.s32.totalorder %s2727_s11, %s2723_s10 }
  0x27   : > { %s3493_s26 = smov (%p48_p7, %s3491_s26), 0  ;;  %s3433_s17 = sadd.s32 4294967295, %s2767_s21  }
  0x28   : > { %3431 = sst [smem:[#allocation30_spill]] %s3493_s26  ;;  %s50_s25 = ssub.s32 %s2763_s20, %s3493_s26 }
  0x29   : > { %s2948_s3 = scalar_select %p81_p8, %s2731_s12, %s83_s23  }
  0x2a   : > { %p97_p10 = scmp.eq.s32.totalorder %s3433_s17, 0  ;;  %s52_s15 = sor.u32 %s51_s16, %s50_s25 }
  0x2b   : > { %3432 = sst [smem:[#allocation31_spill]] %s2948_s3  ;;  %p187_p11 = scmp.eq.s32.totalorder %s79_s7, 0 }
  0x2c   : > { %p53_p12 = scmp.eq.s32.totalorder %s52_s15, 0  ;;  %p2954_p13 = por %p97_p10, %p96_p9 }
  0x2d   : > { %s189_s10 = sadd.s32 1, %s2719_s9  ;;  %p196_p0 = scmp.ne.s32.totalorder %s2719_s9, %s2715_s30 }
  0x2e   : > { %s3434_s4 = scalar_select %p2954_p13, 1, 0 }
  0x2f   : > { %s2962_s11 = scalar_select %p53_p12, %s2739_s14, %s55_s8  }
  0x30   : > { %3435 = sst [smem:[#allocation32_spill]] %s3434_s4  ;;  %p2969_p1 = por %p196_p0, %p63_p2 }
  0x31   : > { %3436 = sst [smem:[#allocation33_spill]] %s2962_s11  ;;  %s266_s16 = sor.u32 %s79_s7, %s50_s25 }
  0x32   : > { %s2965_s23 = scalar_select %p187_p11, %s2719_s9, %s189_s10  }
  0x33   : > { %p267_p3 = scmp.eq.s32.totalorder %s266_s16, 0  ;;  %s269_s17 = sadd.s32 1, %s2711_s29 }
  0x34   : > { %3437 = sst [smem:[#allocation34_spill]] %s2965_s23  ;;  %p279_p5 = scmp.ne.s32.totalorder %s2711_s29, %s2707_s28 }
  0x35   : > { %s3439_s15 = sadd.s32 4294967295, %s2767_s21   ;;  %p285_p9 = scmp.ne.s32.totalorder %s2707_s28, %s2703_s27 }
  0x36   : > { %p280_p7 = scmp.eq.s32.totalorder %s3439_s15, 15  ;;  %s3442_s8 = sadd.s32 4294967294, %s2767_s21  }
  0x37   : > { %s2979_s3 = scalar_select %p267_p3, %s2711_s29, %s269_s17  }
  0x38   : > { %p2981_p8 = por %p280_p7, %p279_p5  ;;  %p286_p10 = scmp.eq.s32.totalorder %s3442_s8, 15 }
  0x39   : > { %3440 = sst [smem:[#allocation35_spill]] %s2979_s3  ;;  %p1955_p2 = scmp.ge.s32.totalorder %s2767_s21, 16 }
  0x3a   : > { %p2989_p11 = por %p286_p10, %p285_p9 }
  0x3b   : > { %302 = sbr.rel (%p1955_p2) target bundleno = 125 (0x7d), region = 16 }
  0x3c   : > { %s3443_s10 = scalar_select %p2989_p11, 1, 0 }
  0x3e   : > { %3444 = sst [smem:[#allocation36_spill]] %s3443_s10 }
  0x40   : > { %305 = sbr.rel (!%p2926_p4) target bundleno = 78 (0x4e), region = 20  ;;  %s307_s7 = sand.u32 (%p2926_p4), 1, %s2739_s14  }
  0x41   : > { %s2017_s25 = sshll.u32 (%p2926_p4), %s2763_s20, 4  ;;  %s1956_s16 = sshll.u32 (%p2926_p4), %s307_s7, 6 }
  0x42   : > { %s312_s17 = sadd.s32 (%p2926_p4), %s2755_s18, %s2017_s25  ;;  %s3445_s0 = sld [smem:[#allocation37_spill]] (%p2926_p4) }
  0x43   : > { %s1959_s15 = sshll.u32 (%p2926_p4), %s312_s17, 3  ;;  %s309_s3 = scalar_lea.vmem (%p2926_p4), [#allocation6], %s1956_s16 }
  0x48   : > { %s314_s23 = scalar_lea.vmem %s3445_s0, %s1959_s15 }
  0x49   : > { %v357_v0 = vld [vmem:[%s314_s23] sm:$0xff]  ;;  %v359_v1 = vld [vmem:[%s314_s23 + $0x10] sm:$0xff] }
  0x4a   : > { %v361_v2 = vld [vmem:[%s314_s23 + $0x20] sm:$0xff]  ;;  %358 = vst [vmem:[%s309_s3] sm:$0xff] %v357_v0  ;;  %360 = vst [vmem:[%s309_s3 + $0x8] sm:$0xff] %v359_v1  ;;  %v363_v3 = vld [vmem:[%s314_s23 + $0x30] sm:$0xff] }
  0x4b   : > { %362 = vst [vmem:[%s309_s3 + $0x10] sm:$0xff] %v361_v2  ;;  %v365_v4 = vld [vmem:[%s314_s23 + $0x40] sm:$0xff]  ;;  %v367_v5 = vld [vmem:[%s314_s23 + $0x50] sm:$0xff]  ;;  %364 = vst [vmem:[%s309_s3 + $0x18] sm:$0xff] %v363_v3 }
  0x4c   : > { %366 = vst [vmem:[%s309_s3 + $0x20] sm:$0xff] %v365_v4  ;;  %368 = vst [vmem:[%s309_s3 + $0x28] sm:$0xff] %v367_v5  ;;  %v369_v6 = vld [vmem:[%s314_s23 + $0x60] sm:$0xff]  ;;  %v371_v7 = vld [vmem:[%s314_s23 + $0x70] sm:$0xff] }
  0x4d   : > { %370 = vst [vmem:[%s309_s3 + $0x30] sm:$0xff] %v369_v6  ;;  %372 = vst [vmem:[%s309_s3 + $0x38] sm:$0xff] %v371_v7 }
  0x4e PF: > { %s3003_s11 = sand.u32 1, %s2731_s12   ;;  %s2018_s22 = sshll.u32 %s2755_s18, 6 }
  0x4f   : > { %s1960_s7 = sshll.u32 %s3003_s11, 7  ;;  %s389_s25 = sadd.s32 %s2759_s19, %s2018_s22 }
  0x50   : > { %s1963_s16 = sshll.u32 %s389_s25, 7  ;;  %s383_s17 = scalar_lea.vmem [#allocation7], %s1960_s7 }
  0x51   : > { %s392_s15 = sshll.u32 %s383_s17, 4  ;;  %s3446_s1 = sld [smem:[#allocation38_spill]]  ;;  %s393_s15 = int_to_ptr.vmem [resolvable:$true] %s392_s15 }
  0x52   : > { %s380_s0 = scalar_lea.sflag [#allocation8], %s3003_s11  ;;  %s2555_s20 = scalar_lea.vmem %s393_s15, 2048 }
  0x53   : > { %p2556_p4 = scmp.ne.s32.totalorder %s393_s15, %s2555_s20  ;;  %s2769_s14 = smov [#allocation7]  }
  0x54   : > { %s2559_s12 = sshll.u32 %s2769_s14, 4  ;;  %s2560_s12 = int_to_ptr.vmem [resolvable:$false] %s2559_s12 }
  0x55   : > { %p2557_p12 = pnand %p2556_p4, %p2939_p6  ;;  %s2561_s18 = scalar_lea.vmem %s2560_s12, 4096 }
  0x56   : > { %p2562_p3 = scmp.lt.s32.totalorder %s393_s15, %s2560_s12  ;;  %p2563_p5 = scmp.lt.s32.totalorder %s2561_s18, %s2555_s20 }
  0x57   : > { %s391_s3 = scalar_lea.hbm %s3446_s1, %s1963_s16  ;;  %p2558_p0 = pneg %p2557_p12 }
  0x58   : > { %p2564_p7 = por %p2563_p5, %p2562_p3 }
  0x5a   : > { %p2565_p9 = pnand %p2564_p7, %p2558_p0 }
  0x5c   : > { %2568 = shalt.err (!%p2565_p9)
}
  0x5d   : > { %s2770_s22 = smov 512   ;;  %s2771_s25 = smov 128  }
  0x5e   : > { %s2772_s17 = smov 8   ;;  %s3447_s2 = sld [smem:[#allocation39_spill]] }
  0x5f   : > { %2357 = dma.hbm_to_vmem [thread:$0]  (%p2939_p6), %s391_s3, 2048, %s393_s15, %s380_s0, %s2770_s22, %s2771_s25, %s2772_s17  }
  0x60   : > { %s406_s1 = scalar_lea.vmem [#allocation10], %s1960_s7  ;;  %s403_s18 = scalar_lea.sflag [#allocation11], %s3003_s11 }
  0x61   : > { %s415_s12 = sshll.u32 %s406_s1, 4  ;;  %s2773_s29 = smov [#allocation10]   ;;  %s416_s12 = int_to_ptr.vmem [resolvable:$true] %s415_s12 }
  0x62   : > { %s2581_s20 = scalar_lea.vmem %s416_s12, 2048  ;;  %s2585_s10 = sshll.u32 %s2773_s29, 4  ;;  %s2586_s10 = int_to_ptr.vmem [resolvable:$false] %s2585_s10 }
  0x63   : > { %p2582_p10 = scmp.ne.s32.totalorder %s416_s12, %s2581_s20  ;;  %s2587_s27 = scalar_lea.vmem %s2586_s10, 4096 }
  0x64   : > { %s414_s14 = scalar_lea.hbm %s3447_s2, %s1963_s16  ;;  %p2588_p12 = scmp.lt.s32.totalorder %s416_s12, %s2586_s10 }
  0x65   : > { %p2583_p2 = pnand %p2582_p10, %p2939_p6  ;;  %p2589_p0 = scmp.lt.s32.totalorder %s2587_s27, %s2581_s20 }
  0x67   : > { %p2584_p4 = pneg %p2583_p2  ;;  %p2590_p3 = por %p2589_p0, %p2588_p12 }
  0x69   : > { %p2591_p5 = pnand %p2590_p3, %p2584_p4 }
  0x6b   : > { %2594 = shalt.err (!%p2591_p5)
}
  0x6c   : > { %2358 = dma.hbm_to_vmem [thread:$0]  (%p2939_p6), %s414_s14, 2048, %s416_s12, %s403_s18, %s2770_s22, %s2771_s25, %s2772_s17  }
  0x6d   : > { %442 = sbr.rel (!%p2969_p1) target bundleno = 117 (0x75), region = 74  ;;  %s444_s0 = sand.u32 (%p2969_p1), 1, %s2719_s9  }
  0x6e   : > { %s1969_s1 = sshll.u32 (%p2969_p1), %s2759_s19, 3  ;;  %s1968_s11 = sshll.u32 (%p2969_p1), %s444_s0, 5 }
  0x6f   : > { %s448_s16 = scalar_lea.vmem (%p2969_p1), %s3390_s5, %s1969_s1  ;;  %s446_s27 = scalar_lea.vmem (%p2969_p1), [#allocation12], %s1968_s11 }
  0x70   : > { %v483_v8 = vld [vmem:[%s448_s16] sm:$0xff] (%p2969_p1) }
  0x71   : > { %v485_v9 = vld [vmem:[%s448_s16 + $0x20] sm:$0xff] (%p2969_p1)  ;;  %484 = vst [vmem:[%s446_s27] sm:$0xff] (%p2969_p1), %v483_v8 }
  0x72   : > { %v487_v10 = vld [vmem:[%s448_s16 + $0x40] sm:$0xff]  ;;  %486 = vst [vmem:[%s446_s27 + $0x8] sm:$0xff] %v485_v9 }
  0x73   : > { %488 = vst [vmem:[%s446_s27 + $0x10] sm:$0xff] %v487_v10  ;;  %v489_v11 = vld [vmem:[%s448_s16 + $0x60] sm:$0xff] }
  0x74   : > { %490 = vst [vmem:[%s446_s27 + $0x18] sm:$0xff] %v489_v11 }
  0x75 PF: > { %496 = sbr.rel (!%p2969_p1) target bundleno = 125 (0x7d), region = 112  ;;  %s498_s24 = sand.u32 (%p2969_p1), 1, %s2719_s9  }
  0x76   : > { %s1971_s10 = sshll.u32 (%p2969_p1), %s2759_s19, 3  ;;  %s1970_s15 = sshll.u32 (%p2969_p1), %s498_s24, 5 }
  0x77   : > { %s502_s25 = scalar_lea.vmem (%p2969_p1), %s3391_s6, %s1971_s10  ;;  %s500_s17 = scalar_lea.vmem (%p2969_p1), [#allocation13], %s1970_s15 }
  0x78   : > { %v537_v12 = vld [vmem:[%s502_s25] sm:$0xff] (%p2969_p1) }
  0x79   : > { %v539_v13 = vld [vmem:[%s502_s25 + $0x20] sm:$0xff] (%p2969_p1)  ;;  %538 = vst [vmem:[%s500_s17] sm:$0xff] (%p2969_p1), %v537_v12 }
  0x7a   : > { %v541_v14 = vld [vmem:[%s502_s25 + $0x40] sm:$0xff]  ;;  %540 = vst [vmem:[%s500_s17 + $0x8] sm:$0xff] %v539_v13 }
  0x7b   : > { %542 = vst [vmem:[%s500_s17 + $0x10] sm:$0xff] %v541_v14  ;;  %v543_v15 = vld [vmem:[%s502_s25 + $0x60] sm:$0xff] }
  0x7c   : > { %544 = vst [vmem:[%s500_s17 + $0x18] sm:$0xff] %v543_v15 }
  0x7d PF: > { %p1972_p6 = scmp.ge.s32.totalorder %s2767_s21, 1  ;;  %p558_p1 = scmp.lt.s32.totalorder %s2767_s21, 17 }
  0x7f   : > { %p559_p7 = pnand %p1972_p6, %p558_p1 }
  0x80   : > { %s3448_s26 = sld [smem:[#allocation20_spill]] (!%p559_p7)  ;;  %s565_s8 = sand.u32 (!%p559_p7), 1, %s2735_s13  }
  0x81   : > { %562 = sbr.rel (%p559_p7) target bundleno = 738 (0x2e2), region = 154  ;;  %s1973_s12 = sshll.u32 (!%p559_p7), %s565_s8, 6 }
  0x82   : > { %s3046_s20 = scalar_lea.vmem (!%p559_p7), [#allocation6], %s1973_s12 }
  0x86   : > { %s571_s14 = sand.u32 1, %s3448_s26  }
  0x87   : > { %s1974_s18 = sshll.u32 %s571_s14, 7  ;;  %s572_s0 = scalar_lea.sflag [#allocation8], %s571_s14 }
  0x88   : > { %s3048_s1 = scalar_lea.vmem [#allocation7], %s1974_s18 }
  0x89   : > { %2690 = dma.done.wait (%p2954_p13), %s572_s0, 2048  }
  0x8a   : > { %2692 = vsyncadd (%p2954_p13), %s572_s0, 4294965248  ;;  %s581_s11 = scalar_lea.sflag [#allocation11], %s571_s14  ;;  %s3054_s7 = scalar_lea.vmem [#allocation10], %s1974_s18 }
  0x8b   : > { %2694 = dma.done.wait (%p2954_p13), %s581_s11, 2048  }
  0x8c   : > { %2696 = vsyncadd (%p2954_p13), %s581_s11, 4294965248  ;;  %s3450_s13 = sld [smem:[#allocation23_spill]]  ;;  %s590_s16 = sand.u32 1, %s2715_s30  }
  0x8d   : > { %s3451_s29 = sld [smem:[#allocation25_spill]]  ;;  %s3409_s27 = sand.u32 1, %s2707_s28  }
  0x8e   : > { %s1976_s24 = sshll.u32 %s590_s16, 5  ;;  %s1978_s10 = sshll.u32 %s3409_s27, 6 }
  0x8f   : > { %s3452_s26 = sld [smem:[#allocation40_spill]]  ;;  %s3083_s2 = scalar_lea.vmem [#allocation13], %s1976_s24 }
  0x90   : > { %s3453_s12 = sld [smem:[#allocation41_spill]] }
  0x91   : > { %s3454_s16 = sld [smem:[#allocation42_spill]] }
  0x92   : > { %s1979_s15 = sshll.u32 %s3450_s13, 4  ;;  %p1985_p13 = scmp.ne.s32.totalorder %s3450_s13, 0 }
  0x93   : > { %p667_p9 = scmp.lt.s32.totalorder %s1979_s15, 31  ;;  %s1983_s3 = sshll.u32 %s3451_s29, 3 }
  0x94   : > { %p679_p10 = scmp.lt.s32.totalorder %s1983_s3, 15  ;;  %s3081_s29 = scalar_lea.vmem [#allocation12], %s1976_s24 }
  0x95   : > { %s3495_s15 = smov (!%p667_p9, %s1979_s15), 31  ;;  %688 = sbr.rel (%p1985_p13) target bundleno = 171 (0xab), region = 178 }
  0x96   : > { %s3497_s3 = smov (!%p679_p10, %s1983_s3), 15  ;;  %s1980_s22 = sshll.u32 %s3495_s15, 3 }
  0x97   : > { %s3069_s23 = scalar_lea.vmem %s3452_s26, %s1980_s22  ;;  %s3074_s30 = scalar_lea.vmem %s3453_s12, %s1980_s22 }
  0x98   : > { %s1984_s18 = sshll.u32 %s3497_s3, 3  ;;  %s3085_s15 = scalar_lea.vmem [#allocation14], %s1978_s10 }
  0x99   : > { %s3079_s27 = scalar_lea.vmem %s3454_s16, %s1984_s18 }
  0x9a   : > { %vm705_vm0 = vcmask 261120   ;;  %v2774_v16 = vmov 0.0  }
  0x9b   : > { %689 = vst [vmem:[#allocation2 + $0x30] sm:$0xff] %v2774_v16  ;;  %690 = vst [vmem:[#allocation2] sm:$0xff] %v2774_v16 }
  0x9c   : > { %691 = vst [vmem:[#allocation2 + $0x18] sm:$0xff] %v2774_v16  ;;  %692 = vst [vmem:[#allocation2 + $0x10] sm:$0xff] %v2774_v16 }
  0x9d   : > { %693 = vst [vmem:[#allocation2 + $0x8] sm:$0xff] %v2774_v16  ;;  %694 = vst [vmem:[#allocation2 + $0x20] sm:$0xff] %v2774_v16 }
  0x9e   : > { %695 = vst [vmem:[#allocation2 + $0x28] sm:$0xff] %v2774_v16  ;;  %696 = vst [vmem:[#allocation2 + $0x38] sm:$0xff] %v2774_v16 }
  0x9f   : > { %697 = vst [vmem:[#allocation3] sm:$0xff] %v2774_v16  ;;  %698 = vst [vmem:[#allocation3 + $0x18] sm:$0xff] %v2774_v16 }
  0xa0   : > { %699 = vst [vmem:[#allocation3 + $0x10] sm:$0xff] %v2774_v16  ;;  %700 = vst [vmem:[#allocation3 + $0x20] sm:$0xff] %v2774_v16 }
  0xa1   : > { %701 = vst [vmem:[#allocation3 + $0x28] sm:$0xff] %v2774_v16  ;;  %702 = vst [vmem:[#allocation3 + $0x8] sm:$0xff] %v2774_v16 }
  0xa2   : > { %703 = vst [vmem:[#allocation3 + $0x30] sm:$0xff] %v2774_v16  ;;  %704 = vst [vmem:[#allocation3 + $0x38] sm:$0xff] %v2774_v16 }
  0xa3   : > { %706 = vst.msk [vmem:[#allocation4] sm:$0xff] %vm705_vm0, %v2774_v16  ;;  %707 = vst.msk [vmem:[#allocation4 + $0x8] sm:$0xff] %vm705_vm0, %v2774_v16 }
  0xa4   : > { %708 = vst.msk [vmem:[#allocation4 + $0x10] sm:$0xff] %vm705_vm0, %v2774_v16  ;;  %709 = vst.msk [vmem:[#allocation4 + $0x18] sm:$0xff] %vm705_vm0, %v2774_v16 }
  0xa5   : > { %710 = vst.msk [vmem:[#allocation4 + $0x20] sm:$0xff] %vm705_vm0, %v2774_v16  ;;  %711 = vst.msk [vmem:[#allocation4 + $0x28] sm:$0xff] %vm705_vm0, %v2774_v16 }
  0xa6   : > { %712 = vst.msk [vmem:[#allocation4 + $0x30] sm:$0xff] %vm705_vm0, %v2774_v16  ;;  %713 = vst.msk [vmem:[#allocation4 + $0x38] sm:$0xff] %vm705_vm0, %v2774_v16 }
  0xa7   : > { %714 = vst.msk [vmem:[#allocation5] sm:$0xff] %vm705_vm0, %v2774_v16  ;;  %715 = vst.msk [vmem:[#allocation5 + $0x8] sm:$0xff] %vm705_vm0, %v2774_v16 }
  0xa8   : > { %716 = vst.msk [vmem:[#allocation5 + $0x10] sm:$0xff] %vm705_vm0, %v2774_v16  ;;  %717 = vst.msk [vmem:[#allocation5 + $0x18] sm:$0xff] %vm705_vm0, %v2774_v16 }
  0xa9   : > { %718 = vst.msk [vmem:[#allocation5 + $0x20] sm:$0xff] %vm705_vm0, %v2774_v16  ;;  %719 = vst.msk [vmem:[#allocation5 + $0x28] sm:$0xff] %vm705_vm0, %v2774_v16 }
  0xaa   : > { %720 = vst.msk [vmem:[#allocation5 + $0x30] sm:$0xff] %vm705_vm0, %v2774_v16  ;;  %721 = vst.msk [vmem:[#allocation5 + $0x38] sm:$0xff] %vm705_vm0, %v2774_v16 }
  0xab PF: > { %v753_v17 = vld [vmem:[%s3048_s1 + $0x78] sm:$0xff]  ;;  %v752_v19 = vld [vmem:[%s3048_s1 + $0x70] sm:$0xff]  ;;  %v751_v21 = vld [vmem:[%s3048_s1 + $0x68] sm:$0xff]  ;;  %vm1157_vm1 = vcmask 261120  }
  0xac   : > { %v898_v18 = vld [vmem:[%s3054_s7 + $0x78] sm:$0xff]  ;;  %2141 = vmatprep.subr.mxu0 %v753_v17  ;;  %v897_v20 = vld [vmem:[%s3054_s7 + $0x70] sm:$0xff]  ;;  %v896_v22 = vld [vmem:[%s3054_s7 + $0x68] sm:$0xff] }
  0xad   : > { %2185 = vmatprep.subr.mxu1 %v898_v18  ;;  %2142 = vmatpush3.msra.mxu0 %v753_v17  ;;  %v750_v23 = vld [vmem:[%s3048_s1 + $0x60] sm:$0xff]  ;;  %v749_v25 = vld [vmem:[%s3048_s1 + $0x58] sm:$0xff]  ;;  %v748_v27 = vld [vmem:[%s3048_s1 + $0x50] sm:$0xff] }
  0xae   : > { %2186 = vmatpush3.msra.mxu1 %v898_v18  ;;  %2143 = vmatprep.subr.mxu0 %v752_v19  ;;  %v895_v24 = vld [vmem:[%s3054_s7 + $0x60] sm:$0xff]  ;;  %v894_v26 = vld [vmem:[%s3054_s7 + $0x58] sm:$0xff]  ;;  %v893_v28 = vld [vmem:[%s3054_s7 + $0x50] sm:$0xff] }
  0xaf   : > { %2187 = vmatprep.subr.mxu1 %v897_v20  ;;  %2144 = vmatpush3.msra.mxu0 %v752_v19  ;;  %v747_v29 = vld [vmem:[%s3048_s1 + $0x48] sm:$0xff]  ;;  %v746_v31 = vld [vmem:[%s3048_s1 + $0x40] sm:$0xff]  ;;  %v745_v33 = vld [vmem:[%s3048_s1 + $0x38] sm:$0xff] }
  0xb0   : > { %2188 = vmatpush3.msra.mxu1 %v897_v20  ;;  %2145 = vmatprep.subr.mxu0 %v751_v21  ;;  %v892_v30 = vld [vmem:[%s3054_s7 + $0x48] sm:$0xff]  ;;  %v891_v32 = vld [vmem:[%s3054_s7 + $0x40] sm:$0xff]  ;;  %v890_v34 = vld [vmem:[%s3054_s7 + $0x38] sm:$0xff] }
  0xb1   : > { %2189 = vmatprep.subr.mxu1 %v896_v22  ;;  %2146 = vmatpush3.msra.mxu0 %v751_v21  ;;  %v744_v35 = vld [vmem:[%s3048_s1 + $0x30] sm:$0xff]  ;;  %v743_v37 = vld [vmem:[%s3048_s1 + $0x28] sm:$0xff]  ;;  %v742_v39 = vld [vmem:[%s3048_s1 + $0x20] sm:$0xff] }
  0xb2   : > { %2190 = vmatpush3.msra.mxu1 %v896_v22  ;;  %2147 = vmatprep.subr.mxu0 %v750_v23  ;;  %v889_v36 = vld [vmem:[%s3054_s7 + $0x30] sm:$0xff]  ;;  %v888_v38 = vld [vmem:[%s3054_s7 + $0x28] sm:$0xff]  ;;  %v887_v40 = vld [vmem:[%s3054_s7 + $0x20] sm:$0xff] }
  0xb3   : > { %2191 = vmatprep.subr.mxu1 %v895_v24  ;;  %2148 = vmatpush3.msra.mxu0 %v750_v23  ;;  %v741_v41 = vld [vmem:[%s3048_s1 + $0x18] sm:$0xff]  ;;  %v740_v43 = vld [vmem:[%s3048_s1 + $0x10] sm:$0xff]  ;;  %v739_v45 = vld [vmem:[%s3048_s1 + $0x8] sm:$0xff] }
  0xb4   : > { %2192 = vmatpush3.msra.mxu1 %v895_v24  ;;  %2149 = vmatprep.subr.mxu0 %v749_v25  ;;  %v886_v42 = vld [vmem:[%s3054_s7 + $0x18] sm:$0xff]  ;;  %v885_v44 = vld [vmem:[%s3054_s7 + $0x10] sm:$0xff]  ;;  %v884_v46 = vld [vmem:[%s3054_s7 + $0x8] sm:$0xff] }
  0xb5   : > { %2193 = vmatprep.subr.mxu1 %v894_v26  ;;  %2150 = vmatpush3.msra.mxu0 %v749_v25  ;;  %v738_v47 = vld [vmem:[%s3048_s1] sm:$0xff]  ;;  %v3140_v50 = vld [vmem:[%s3046_s20 + $0x8] sm:$0xff]  ;;  %v1043_v51 = vld [vmem:[%s3069_s23 + $0x78] sm:$0xff] }
  0xb6   : > { %2194 = vmatpush3.msra.mxu1 %v894_v26  ;;  %2151 = vmatprep.subr.mxu0 %v748_v27  ;;  %v883_v48 = vld [vmem:[%s3054_s7] sm:$0xff]  ;;  %v1189_v52 = vld [vmem:[%s3074_s30 + $0x78] sm:$0xff]  ;;  %v1042_v53 = vld [vmem:[%s3069_s23 + $0x70] sm:$0xff] }
  0xb7   : > { %2195 = vmatprep.subr.mxu1 %v893_v28  ;;  %2152 = vmatpush3.msra.mxu0 %v748_v27  ;;  %v3137_v49 = vld [vmem:[%s3046_s20] sm:$0xff]  ;;  %v1188_v54 = vld [vmem:[%s3074_s30 + $0x70] sm:$0xff]  ;;  %v1041_v55 = vld [vmem:[%s3069_s23 + $0x68] sm:$0xff] }
  0xb8   : > { %2196 = vmatpush3.msra.mxu1 %v893_v28  ;;  %2153 = vmatprep.subr.mxu0 %v747_v29  ;;  %v1187_v56 = vld [vmem:[%s3074_s30 + $0x68] sm:$0xff]  ;;  %v1040_v57 = vld [vmem:[%s3069_s23 + $0x60] sm:$0xff]  ;;  %v1039_v59 = vld [vmem:[%s3069_s23 + $0x58] sm:$0xff] }
  0xb9   : > { %2197 = vmatprep.subr.mxu1 %v892_v30  ;;  %2154 = vmatpush3.msra.mxu0 %v747_v29  ;;  %v1186_v58 = vld [vmem:[%s3074_s30 + $0x60] sm:$0xff]  ;;  %v1185_v60 = vld [vmem:[%s3074_s30 + $0x58] sm:$0xff]  ;;  %v1038_v61 = vld [vmem:[%s3069_s23 + $0x50] sm:$0xff] }
  0xba   : > { %2198 = vmatpush3.msra.mxu1 %v892_v30  ;;  %2155 = vmatprep.subr.mxu0 %v746_v31  ;;  %v1184_v62 = vld [vmem:[%s3074_s30 + $0x50] sm:$0xff]  ;;  %v1037_v63 = vld [vmem:[%s3069_s23 + $0x48] sm:$0xff]  ;;  %v1036_v1 = vld [vmem:[%s3069_s23 + $0x40] sm:$0xff] }
  0xbb   : > { %2199 = vmatprep.subr.mxu1 %v891_v32  ;;  %2156 = vmatpush3.msra.mxu0 %v746_v31  ;;  %v1183_v0 = vld [vmem:[%s3074_s30 + $0x48] sm:$0xff]  ;;  %v1182_v2 = vld [vmem:[%s3074_s30 + $0x40] sm:$0xff]  ;;  %v1035_v3 = vld [vmem:[%s3069_s23 + $0x38] sm:$0xff] }
  0xbc   : > { %2200 = vmatpush3.msra.mxu1 %v891_v32  ;;  %2157 = vmatprep.subr.mxu0 %v745_v33  ;;  %v1181_v4 = vld [vmem:[%s3074_s30 + $0x38] sm:$0xff]  ;;  %v3165_v5 = vld [vmem:[%s3046_s20 + $0x10] sm:$0xff]  ;;  %v1033_v9 = vld [vmem:[%s3069_s23 + $0x28] sm:$0xff] }
  0xbd   : > { %2201 = vmatprep.subr.mxu1 %v890_v34  ;;  %2158 = vmatpush3.msra.mxu0 %v745_v33  ;;  %v3168_v6 = vld [vmem:[%s3046_s20 + $0x18] sm:$0xff]  ;;  %v1034_v7 = vld [vmem:[%s3069_s23 + $0x30] sm:$0xff]  ;;  %v1179_v10 = vld [vmem:[%s3074_s30 + $0x28] sm:$0xff] }
  0xbe   : > { %2202 = vmatpush3.msra.mxu1 %v890_v34  ;;  %2159 = vmatprep.subr.mxu0 %v744_v35  ;;  %v1180_v8 = vld [vmem:[%s3074_s30 + $0x30] sm:$0xff]  ;;  %v726_v11 = vld [vmem:[%s3046_s20 + $0x20] sm:$0xff]  ;;  %v727_v12 = vld [vmem:[%s3046_s20 + $0x28] sm:$0xff] }
  0xbf   : > { %2203 = vmatprep.subr.mxu1 %v889_v36  ;;  %2160 = vmatpush3.msra.mxu0 %v744_v35  ;;  %v1032_v13 = vld [vmem:[%s3069_s23 + $0x20] sm:$0xff]  ;;  %v1031_v15 = vld [vmem:[%s3069_s23 + $0x18] sm:$0xff]  ;;  %v728_v17 = vld [vmem:[%s3046_s20 + $0x30] sm:$0xff] }
  0xc0   : > { %2204 = vmatpush3.msra.mxu1 %v889_v36  ;;  %2161 = vmatprep.subr.mxu0 %v743_v37  ;;  %v1178_v14 = vld [vmem:[%s3074_s30 + $0x20] sm:$0xff]  ;;  %v1177_v16 = vld [vmem:[%s3074_s30 + $0x18] sm:$0xff]  ;;  %v1030_v19 = vld [vmem:[%s3069_s23 + $0x10] sm:$0xff] }
  0xc1   : > { %2205 = vmatprep.subr.mxu1 %v888_v38  ;;  %2162 = vmatpush3.msra.mxu0 %v743_v37  ;;  %v729_v18 = vld [vmem:[%s3046_s20 + $0x38] sm:$0xff]  ;;  %v1176_v20 = vld [vmem:[%s3074_s30 + $0x10] sm:$0xff]  ;;  %v1029_v21 = vld [vmem:[%s3069_s23 + $0x8] sm:$0xff]  ;;  %s3455_s20 = sld [smem:[#allocation23_spill]] }
  0xc2   : > { %2206 = vmatpush3.msra.mxu1 %v888_v38  ;;  %2163 = vmatprep.subr.mxu0 %v742_v39  ;;  %v1175_v22 = vld [vmem:[%s3074_s30 + $0x8] sm:$0xff]  ;;  %v1028_v23 = vld [vmem:[%s3069_s23] sm:$0xff]  ;;  %v876_v26 = vld [vmem:[#allocation3 + $0x18] sm:$0xff] }
  0xc3   : > { %2207 = vmatprep.subr.mxu1 %v887_v40  ;;  %2164 = vmatpush3.msra.mxu0 %v742_v39  ;;  %v1174_v24 = vld [vmem:[%s3074_s30] sm:$0xff]  ;;  %v730_v29 = vld [vmem:[#allocation2 + $0x30] sm:$0xff] }
  0xc4   : > { %2208 = vmatpush3.msra.mxu1 %v887_v40  ;;  %2165 = vmatprep.subr.mxu0 %v741_v41  ;;  %v731_v25 = vld [vmem:[#allocation2] sm:$0xff]  ;;  %v733_v37 = vld [vmem:[#allocation2 + $0x10] sm:$0xff] }
  0xc5   : > { %2209 = vmatprep.subr.mxu1 %v886_v42  ;;  %2166 = vmatpush3.msra.mxu0 %v741_v41  ;;  %v875_v30 = vld [vmem:[#allocation3] sm:$0xff]  ;;  %v732_v41 = vld [vmem:[#allocation2 + $0x18] sm:$0xff] }
  0xc6   : > { %2210 = vmatpush3.msra.mxu1 %v886_v42  ;;  %2167 = vmatprep.subr.mxu0 %v740_v43  ;;  %v878_v38 = vld [vmem:[#allocation3 + $0x20] sm:$0xff]  ;;  %v877_v42 = vld [vmem:[#allocation3 + $0x10] sm:$0xff] }
  0xc7   : > { %2211 = vmatprep.subr.mxu1 %v885_v44  ;;  %2168 = vmatpush3.msra.mxu0 %v740_v43  ;;  %p1986_p2 = scmp.ne.s32.totalorder %s3455_s20, 1 }
  0xc8   : > { %2212 = vmatpush3.msra.mxu1 %v885_v44  ;;  %2169 = vmatprep.subr.mxu0 %v739_v45 }
  0xc9   : > { %2213 = vmatprep.subr.mxu1 %v884_v46  ;;  %2170 = vmatpush3.msra.mxu0 %v739_v45 }
  0xca   : > { %2214 = vmatpush3.msra.mxu1 %v884_v46  ;;  %2171 = vmatprep.subr.mxu0 %v738_v47 }
  0xcb   : > { %2215 = vmatprep.subr.mxu1 %v883_v48  ;;  %2172 = vmatpush3.msra.mxu0 %v738_v47 }
  0xcc   : > { %2173 = vmatprep.mubr.f32.mxu0 %v3137_v49  ;;  %2216 = vmatpush3.msra.mxu1 %v883_v48 }
  0xcd   : > { %2217 = vmatprep.mubr.f32.mxu1 %v3137_v49  ;;  %2174 = vmatmul.mubr.f32.vlgmr.msra.gmra.mxu0 %v3140_v50 }
  0xce   : > { %2218 = vmatmul.mubr.f32.vlgmr.msra.gmra.mxu1 %v3140_v50  ;;  %2229 = vmatprep.subr.mxu0 %v1043_v51 }
  0xcf   : > { %2273 = vmatprep.subr.mxu1 %v1189_v52  ;;  %2230 = vmatpush3.msra.mxu0 %v1043_v51 }
  0xd0   : > { %2274 = vmatpush3.msra.mxu1 %v1189_v52  ;;  %2231 = vmatprep.subr.mxu0 %v1042_v53 }
  0xd1   : > { %2275 = vmatprep.subr.mxu1 %v1188_v54  ;;  %2232 = vmatpush3.msra.mxu0 %v1042_v53  ;;  %v734_v53 = vld [vmem:[#allocation2 + $0x8] sm:$0xff] }
  0xd2   : > { %2276 = vmatpush3.msra.mxu1 %v1188_v54  ;;  %2233 = vmatprep.subr.mxu0 %v1041_v55  ;;  %v879_v54 = vld [vmem:[#allocation3 + $0x28] sm:$0xff] }
  0xd3   : > { %2277 = vmatprep.subr.mxu1 %v1187_v56  ;;  %2234 = vmatpush3.msra.mxu0 %v1041_v55 }
  0xd4   : > { %2278 = vmatpush3.msra.mxu1 %v1187_v56  ;;  %2235 = vmatprep.subr.mxu0 %v1040_v57 }
  0xd5   : > { %2279 = vmatprep.subr.mxu1 %v1186_v58  ;;  %2236 = vmatpush3.msra.mxu0 %v1040_v57 }
  0xd6   : > { %2280 = vmatpush3.msra.mxu1 %v1186_v58  ;;  %2237 = vmatprep.subr.mxu0 %v1039_v59 }
  0xd7   : > { %2281 = vmatprep.subr.mxu1 %v1185_v60  ;;  %2238 = vmatpush3.msra.mxu0 %v1039_v59 }
  0xd8   : > { %2282 = vmatpush3.msra.mxu1 %v1185_v60  ;;  %2239 = vmatprep.subr.mxu0 %v1038_v61 }
  0xd9   : > { %2283 = vmatprep.subr.mxu1 %v1184_v62  ;;  %2240 = vmatpush3.msra.mxu0 %v1038_v61  ;;  %v737_v61 = vld [vmem:[#allocation2 + $0x38] sm:$0xff] }
  0xda   : > { %2284 = vmatpush3.msra.mxu1 %v1184_v62  ;;  %2241 = vmatprep.subr.mxu0 %v1037_v63  ;;  %v882_v62 = vld [vmem:[#allocation3 + $0x38] sm:$0xff] }
  0xdb   : > { %2285 = vmatprep.subr.mxu1 %v1183_v0  ;;  %2242 = vmatpush3.msra.mxu0 %v1037_v63 }
  0xdc   : > { %2286 = vmatpush3.msra.mxu1 %v1183_v0  ;;  %2243 = vmatprep.subr.mxu0 %v1036_v1 }
  0xdd   : > { %2287 = vmatprep.subr.mxu1 %v1182_v2  ;;  %2244 = vmatpush3.msra.mxu0 %v1036_v1  ;;  %v736_v1 = vld [vmem:[#allocation2 + $0x28] sm:$0xff] }
  0xde   : > { %2288 = vmatpush3.msra.mxu1 %v1182_v2  ;;  %2245 = vmatprep.subr.mxu0 %v1035_v3  ;;  %v881_v2 = vld [vmem:[#allocation3 + $0x30] sm:$0xff] }
  0xdf   : > { %2289 = vmatprep.subr.mxu1 %v1181_v4  ;;  %2176 = vmatprep.mubr.f32.mxu0 %v3165_v5 }
  0xe0   : > { %2220 = vmatprep.mubr.f32.mxu1 %v3165_v5  ;;  %2246 = vmatpush3.msra.mxu0 %v1035_v3 }
  0xe1   : > { %2290 = vmatpush3.msra.mxu1 %v1181_v4  ;;  %2177 = vmatmul.mubr.f32.gmra.mxu0 %v3168_v6 }
  0xe2   : > { %2221 = vmatmul.mubr.f32.gmra.mxu1 %v3168_v6  ;;  %2247 = vmatprep.subr.mxu0 %v1034_v7 }
  0xe3   : > { %2291 = vmatprep.subr.mxu1 %v1180_v8  ;;  %2248 = vmatpush3.msra.mxu0 %v1034_v7 }
  0xe4   : > { %2292 = vmatpush3.msra.mxu1 %v1180_v8  ;;  %2249 = vmatprep.subr.mxu0 %v1033_v9 }
  0xe5   : > { %2293 = vmatprep.subr.mxu1 %v1179_v10  ;;  %2179 = vmatprep.mubr.f32.mxu0 %v726_v11 }
  0xe6   : > { %2223 = vmatprep.mubr.f32.mxu1 %v726_v11  ;;  %2250 = vmatpush3.msra.mxu0 %v1033_v9  ;;  %v1021_v9 = vld [vmem:[#allocation4 + $0x8] sm:$0xff] }
  0xe7   : > { %2294 = vmatpush3.msra.mxu1 %v1179_v10  ;;  %2180 = vmatmul.mubr.f32.gmra.mxu0 %v727_v12  ;;  %v1167_v10 = vld [vmem:[#allocation5 + $0x8] sm:$0xff] }
  0xe8   : > { %2224 = vmatmul.mubr.f32.gmra.mxu1 %v727_v12  ;;  %2251 = vmatprep.subr.mxu0 %v1032_v13 }
  0xe9   : > { %2295 = vmatprep.subr.mxu1 %v1178_v14  ;;  %2252 = vmatpush3.msra.mxu0 %v1032_v13  ;;  %v1020_v13 = vld [vmem:[#allocation4] sm:$0xff] }
  0xea   : > { %2296 = vmatpush3.msra.mxu1 %v1178_v14  ;;  %2253 = vmatprep.subr.mxu0 %v1031_v15  ;;  %v1166_v14 = vld [vmem:[#allocation5] sm:$0xff] }
  0xeb   : > { %2297 = vmatprep.subr.mxu1 %v1177_v16  ;;  %2182 = vmatprep.mubr.f32.mxu0 %v728_v17 }
  0xec   : > { %2226 = vmatprep.mubr.f32.mxu1 %v728_v17  ;;  %2254 = vmatpush3.msra.mxu0 %v1031_v15 }
  0xed   : > { %2298 = vmatpush3.msra.mxu1 %v1177_v16  ;;  %2183 = vmatmul.mubr.f32.gmra.mxu0 %v729_v18 }
  0xee   : > { %2227 = vmatmul.mubr.f32.gmra.mxu1 %v729_v18  ;;  %2255 = vmatprep.subr.mxu0 %v1030_v19 }
  0xef   : > { %2299 = vmatprep.subr.mxu1 %v1176_v20  ;;  %2256 = vmatpush3.msra.mxu0 %v1030_v19  ;;  %v1023_v19 = vld [vmem:[#allocation4 + $0x18] sm:$0xff] }
  0xf0   : > { %2300 = vmatpush3.msra.mxu1 %v1176_v20  ;;  %2257 = vmatprep.subr.mxu0 %v1029_v21  ;;  %v1169_v20 = vld [vmem:[#allocation5 + $0x18] sm:$0xff] }
  0xf1   : > { %2301 = vmatprep.subr.mxu1 %v1175_v22  ;;  %2258 = vmatpush3.msra.mxu0 %v1029_v21 }
  0xf2   : > { %2302 = vmatpush3.msra.mxu1 %v1175_v22  ;;  %2259 = vmatprep.subr.mxu0 %v1028_v23 }
  0xf3   : > { %2303 = vmatprep.subr.mxu1 %v1174_v24  ;;  %2260 = vmatpush3.msra.mxu0 %v1028_v23 }
  0xf4   : > { %2261 = vmatprep.mubr.f32.mxu0 %v3137_v49  ;;  %2304 = vmatpush3.msra.mxu1 %v1174_v24 }
  0xf5   : > { %2305 = vmatprep.mubr.f32.mxu1 %v3137_v49  ;;  %2262 = vmatmul.mubr.f32.vlgmr.msra.gmra.mxu0 %v3140_v50  ;;  %v735_v49 = vld [vmem:[#allocation2 + $0x20] sm:$0xff] }
  0xf6   : > { %2306 = vmatmul.mubr.f32.vlgmr.msra.gmra.mxu1 %v3140_v50  ;;  %2264 = vmatprep.mubr.f32.mxu0 %v3165_v5  ;;  %v880_v50 = vld [vmem:[#allocation3 + $0x8] sm:$0xff] }
  0xf7   : > { %2308 = vmatprep.mubr.f32.mxu1 %v3165_v5 }
  0xf9   : > { %2265 = vmatmul.mubr.f32.gmra.mxu0 %v3168_v6 }
  0xfa   : > { %2309 = vmatmul.mubr.f32.gmra.mxu1 %v3168_v6  ;;  %2267 = vmatprep.mubr.f32.mxu0 %v726_v11 }
  0xfb   : > { %2311 = vmatprep.mubr.f32.mxu1 %v726_v11 }
  0xfd   : > { %2268 = vmatmul.mubr.f32.gmra.mxu0 %v727_v12 }
  0xfe   : > { %2312 = vmatmul.mubr.f32.gmra.mxu1 %v727_v12  ;;  %2270 = vmatprep.mubr.f32.mxu0 %v728_v17 }
  0xff   : > { %2314 = vmatprep.mubr.f32.mxu1 %v728_v17 }
 0x101   : > { %2271 = vmatmul.mubr.f32.gmra.mxu0 %v729_v18 }
 0x102   : > { %2315 = vmatmul.mubr.f32.gmra.mxu1 %v729_v18 }
 0x18d   : > { %v2175_v27 = vpop.f32.mrf.mxu0 }
 0x18e   : > { %v2219_v28 = vpop.f32.mrf.mxu1  ;;  %v860_v31 = vadd.f32 %v2175_v27, %v731_v25  ;;  %v1022_v25 = vld [vmem:[#allocation4 + $0x10] sm:$0xff] }
 0x18f   : > { %v1005_v32 = vadd.f32 %v2219_v28, %v876_v26  ;;  %v820_v33 = vpop.f32.mrf.mxu0  ;;  %v1168_v26 = vld [vmem:[#allocation5 + $0x10] sm:$0xff] }
 0x190   : > { %v965_v34 = vpop.f32.mrf.mxu1  ;;  %868 = vst [vmem:[#allocation2] sm:$0xff] %v860_v31  ;;  %v859_v35 = vadd.f32 %v820_v33, %v730_v29  ;;  %v1025_v31 = vld [vmem:[#allocation4 + $0x28] sm:$0xff] }
 0x191   : > { %1013 = vst [vmem:[#allocation3 + $0x18] sm:$0xff] %v1005_v32  ;;  %v1004_v36 = vadd.f32 %v965_v34, %v875_v30  ;;  %v1171_v32 = vld [vmem:[#allocation5 + $0x28] sm:$0xff] }
 0x192   : > { %867 = vst [vmem:[#allocation2 + $0x30] sm:$0xff] %v859_v35 }
 0x193   : > { %1012 = vst [vmem:[#allocation3] sm:$0xff] %v1004_v36 }
 0x1a1   : > { %v2178_v39 = vpop.f32.mrf.mxu0 }
 0x1a2   : > { %v2222_v40 = vpop.f32.mrf.mxu1  ;;  %v862_v43 = vadd.f32 %v2178_v39, %v733_v37  ;;  %v1024_v37 = vld [vmem:[#allocation4 + $0x20] sm:$0xff] }
 0x1a3   : > { %v1007_v44 = vadd.f32 %v2222_v40, %v878_v38  ;;  %v830_v45 = vpop.f32.mrf.mxu0  ;;  %v1170_v38 = vld [vmem:[#allocation5 + $0x20] sm:$0xff] }
 0x1a4   : > { %v975_v46 = vpop.f32.mrf.mxu1  ;;  %870 = vst [vmem:[#allocation2 + $0x10] sm:$0xff] %v862_v43  ;;  %v861_v47 = vadd.f32 %v830_v45, %v732_v41  ;;  %v1027_v43 = vld [vmem:[#allocation4 + $0x38] sm:$0xff] }
 0x1a5   : > { %1015 = vst [vmem:[#allocation3 + $0x20] sm:$0xff] %v1007_v44  ;;  %v1006_v48 = vadd.f32 %v975_v46, %v877_v42  ;;  %v1173_v44 = vld [vmem:[#allocation5 + $0x38] sm:$0xff] }
 0x1a6   : > { %869 = vst [vmem:[#allocation2 + $0x18] sm:$0xff] %v861_v47 }
 0x1a7   : > { %1014 = vst [vmem:[#allocation3 + $0x10] sm:$0xff] %v1006_v48  ;;  %v2181_v51 = vpop.f32.mrf.mxu0 }
 0x1a8   : > { %v2225_v52 = vpop.f32.mrf.mxu1  ;;  %v864_v55 = vadd.f32 %v2181_v51, %v735_v49  ;;  %v1026_v49 = vld [vmem:[#allocation4 + $0x30] sm:$0xff] }
 0x1a9   : > { %v1009_v56 = vadd.f32 %v2225_v52, %v880_v50  ;;  %v840_v57 = vpop.f32.mrf.mxu0  ;;  %v1172_v50 = vld [vmem:[#allocation5 + $0x30] sm:$0xff] }
 0x1aa   : > { %v985_v58 = vpop.f32.mrf.mxu1  ;;  %872 = vst [vmem:[#allocation2 + $0x20] sm:$0xff] %v864_v55  ;;  %v863_v59 = vadd.f32 %v840_v57, %v734_v53 }
 0x1ab   : > { %1017 = vst [vmem:[#allocation3 + $0x8] sm:$0xff] %v1009_v56  ;;  %v1008_v60 = vadd.f32 %v985_v58, %v879_v54 }
 0x1ac   : > { %871 = vst [vmem:[#allocation2 + $0x8] sm:$0xff] %v863_v59 }
 0x1ad   : > { %1016 = vst [vmem:[#allocation3 + $0x28] sm:$0xff] %v1008_v60  ;;  %v2184_v63 = vpop.f32.mrf.mxu0 }
 0x1ae   : > { %v2228_v0 = vpop.f32.mrf.mxu1  ;;  %v866_v3 = vadd.f32 %v2184_v63, %v737_v61 }
 0x1af   : > { %v1011_v4 = vadd.f32 %v2228_v0, %v882_v62  ;;  %v850_v5 = vpop.f32.mrf.mxu0 }
 0x1b0   : > { %v995_v6 = vpop.f32.mrf.mxu1  ;;  %874 = vst [vmem:[#allocation2 + $0x38] sm:$0xff] %v866_v3  ;;  %v865_v7 = vadd.f32 %v850_v5, %v736_v1 }
 0x1b1   : > { %1019 = vst [vmem:[#allocation3 + $0x38] sm:$0xff] %v1011_v4  ;;  %v1010_v8 = vadd.f32 %v995_v6, %v881_v2 }
 0x1b2   : > { %873 = vst [vmem:[#allocation2 + $0x28] sm:$0xff] %v865_v7 }
 0x1b3   : > { %1018 = vst [vmem:[#allocation3 + $0x30] sm:$0xff] %v1010_v8 }
 0x1b5   : > { %v2263_v11 = vpop.f32.mrf.mxu0 }
 0x1b6   : > { %v2307_v12 = vpop.f32.mrf.mxu1  ;;  %v1150_v15 = vadd.f32 %v2263_v11, %v1021_v9 }
 0x1b7   : > { %v1296_v16 = vadd.f32 %v2307_v12, %v1167_v10  ;;  %v1110_v17 = vpop.f32.mrf.mxu0 }
 0x1b8   : > { %v1256_v18 = vpop.f32.mrf.mxu1  ;;  %1159 = vst.msk [vmem:[#allocation4 + $0x8] sm:$0xff] %vm1157_vm1, %v1150_v15  ;;  %v1149_v21 = vadd.f32 %v1110_v17, %v1020_v13 }
 0x1b9   : > { %1304 = vst.msk [vmem:[#allocation5 + $0x8] sm:$0xff] %vm1157_vm1, %v1296_v16  ;;  %v1295_v22 = vadd.f32 %v1256_v18, %v1166_v14  ;;  %v2266_v23 = vpop.f32.mrf.mxu0 }
 0x1ba   : > { %v2310_v24 = vpop.f32.mrf.mxu1  ;;  %1158 = vst.msk [vmem:[#allocation4] sm:$0xff] %vm1157_vm1, %v1149_v21  ;;  %v1152_v27 = vadd.f32 %v2266_v23, %v1023_v19 }
 0x1bb   : > { %1303 = vst.msk [vmem:[#allocation5] sm:$0xff] %vm1157_vm1, %v1295_v22  ;;  %v1298_v28 = vadd.f32 %v2310_v24, %v1169_v20  ;;  %v1120_v29 = vpop.f32.mrf.mxu0 }
 0x1bc   : > { %v1266_v30 = vpop.f32.mrf.mxu1  ;;  %1161 = vst.msk [vmem:[#allocation4 + $0x18] sm:$0xff] %vm1157_vm1, %v1152_v27  ;;  %v1151_v33 = vadd.f32 %v1120_v29, %v1022_v25 }
 0x1bd   : > { %1306 = vst.msk [vmem:[#allocation5 + $0x18] sm:$0xff] %vm1157_vm1, %v1298_v28  ;;  %v1297_v34 = vadd.f32 %v1266_v30, %v1168_v26  ;;  %v2269_v35 = vpop.f32.mrf.mxu0 }
 0x1be   : > { %v2313_v36 = vpop.f32.mrf.mxu1  ;;  %1160 = vst.msk [vmem:[#allocation4 + $0x10] sm:$0xff] %vm1157_vm1, %v1151_v33  ;;  %v1154_v39 = vadd.f32 %v2269_v35, %v1025_v31 }
 0x1bf   : > { %1305 = vst.msk [vmem:[#allocation5 + $0x10] sm:$0xff] %vm1157_vm1, %v1297_v34  ;;  %v1300_v40 = vadd.f32 %v2313_v36, %v1171_v32  ;;  %v1130_v41 = vpop.f32.mrf.mxu0 }
 0x1c0   : > { %v1276_v42 = vpop.f32.mrf.mxu1  ;;  %1163 = vst.msk [vmem:[#allocation4 + $0x28] sm:$0xff] %vm1157_vm1, %v1154_v39  ;;  %v1153_v45 = vadd.f32 %v1130_v41, %v1024_v37 }
 0x1c1   : > { %1308 = vst.msk [vmem:[#allocation5 + $0x28] sm:$0xff] %vm1157_vm1, %v1300_v40  ;;  %v1299_v46 = vadd.f32 %v1276_v42, %v1170_v38  ;;  %v2272_v47 = vpop.f32.mrf.mxu0 }
 0x1c2   : > { %v2316_v48 = vpop.f32.mrf.mxu1  ;;  %1162 = vst.msk [vmem:[#allocation4 + $0x20] sm:$0xff] %vm1157_vm1, %v1153_v45  ;;  %v1156_v51 = vadd.f32 %v2272_v47, %v1027_v43 }
 0x1c3   : > { %1307 = vst.msk [vmem:[#allocation5 + $0x20] sm:$0xff] %vm1157_vm1, %v1299_v46  ;;  %v1302_v52 = vadd.f32 %v2316_v48, %v1173_v44  ;;  %v1140_v53 = vpop.f32.mrf.mxu0  ;;  %1314 = sbr.rel (%p1986_p2) target bundleno = 711 (0x2c7), region = 182 }
 0x1c4   : > { %v1286_v54 = vpop.f32.mrf.mxu1  ;;  %1165 = vst.msk [vmem:[#allocation4 + $0x38] sm:$0xff] %vm1157_vm1, %v1156_v51  ;;  %v1155_v55 = vadd.f32 %v1140_v53, %v1026_v49 }
 0x1c5   : > { %1310 = vst.msk [vmem:[#allocation5 + $0x38] sm:$0xff] %vm1157_vm1, %v1302_v52  ;;  %v1301_v56 = vadd.f32 %v1286_v54, %v1172_v50 }
 0x1c6   : > { %1164 = vst.msk [vmem:[#allocation4 + $0x30] sm:$0xff] %vm1157_vm1, %v1155_v55 }
 0x1c7   : > { %1309 = vst.msk [vmem:[#allocation5 + $0x30] sm:$0xff] %vm1157_vm1, %v1301_v56 }
 0x1c8   : > { %v1366_v57 = vld [vmem:[%s3081_s29 + $0x18] sm:$0xff]  ;;  %v1365_v58 = vld [vmem:[%s3081_s29 + $0x10] sm:$0xff]  ;;  %v1315_v59 = vld [vmem:[%s3079_s27] sm:$0xff] }
 0x1c9   : > { %2317 = vmatprep.subr.mxu0 %v1366_v57  ;;  %v1323_v60 = vld [vmem:[#allocation4] sm:$0xff]  ;;  %v1364_v61 = vld [vmem:[%s3081_s29 + $0x8] sm:$0xff]  ;;  %v1317_v1 = vld [vmem:[%s3079_s27 + $0x10] sm:$0xff] }
 0x1ca   : > { %2318 = vmatpush3.msra.mxu0 %v1366_v57  ;;  %v1331_v62 = vmul.f32 %v1323_v60, %v1315_v59  ;;  %v1316_v63 = vld [vmem:[%s3079_s27 + $0x8] sm:$0xff]  ;;  %v1325_v2 = vld [vmem:[#allocation4 + $0x10] sm:$0xff]  ;;  %v1363_v3 = vld [vmem:[%s3081_s29] sm:$0xff] }
 0x1cb   : > { %v1324_v0 = vld [vmem:[#allocation4 + $0x8] sm:$0xff]  ;;  %2319 = vmatprep.subr.mxu0 %v1365_v58  ;;  %v1333_v5 = vmul.f32 %v1325_v2, %v1317_v1  ;;  %v1318_v6 = vld [vmem:[%s3079_s27 + $0x18] sm:$0xff]  ;;  %v1319_v9 = vld [vmem:[%s3079_s27 + $0x20] sm:$0xff] }
 0x1cc   : > { %2320 = vmatpush3.msra.mxu0 %v1365_v58  ;;  %2325 = vmatprep.mubr.msk.f32.mxu0 %vm1157_vm1, %v1331_v62  ;;  %v1332_v4 = vmul.f32 %v1324_v0, %v1316_v63  ;;  %v1326_v7 = vld [vmem:[#allocation4 + $0x18] sm:$0xff]  ;;  %v1327_v10 = vld [vmem:[#allocation4 + $0x20] sm:$0xff]  ;;  %v1514_v11 = vld [vmem:[%s3083_s2 + $0x10] sm:$0xff] }
 0x1cd   : > { %2321 = vmatprep.subr.mxu0 %v1364_v61  ;;  %v1515_v8 = vld [vmem:[%s3083_s2 + $0x18] sm:$0xff]  ;;  %v1513_v12 = vld [vmem:[%s3083_s2 + $0x8] sm:$0xff]  ;;  %v1339_v13 = vld [vmem:[#allocation5] sm:$0xff]  ;;  %v1334_v15 = vmul.f32 %v1326_v7, %v1318_v6  ;;  %v1335_v18 = vmul.f32 %v1327_v10, %v1319_v9 }
 0x1ce   : > { %2322 = vmatpush3.msra.mxu0 %v1364_v61  ;;  %2337 = vmatprep.subr.mxu1 %v1515_v8  ;;  %v1340_v14 = vld [vmem:[#allocation5 + $0x8] sm:$0xff]  ;;  %v1347_v16 = vmul.f32 %v1339_v13, %v1315_v59  ;;  %v1341_v17 = vld [vmem:[#allocation5 + $0x10] sm:$0xff]  ;;  %v1512_v21 = vld [vmem:[%s3083_s2] sm:$0xff] }
 0x1cf   : > { %2323 = vmatprep.subr.mxu0 %v1363_v3  ;;  %2338 = vmatpush3.msra.mxu1 %v1515_v8  ;;  %v1320_v19 = vld [vmem:[%s3079_s27 + $0x28] sm:$0xff]  ;;  %v1321_v22 = vld [vmem:[%s3079_s27 + $0x30] sm:$0xff]  ;;  %v1348_v24 = vmul.f32 %v1340_v14, %v1316_v63  ;;  %v1349_v25 = vmul.f32 %v1341_v17, %v1317_v1  ;;  %v1342_v26 = vld [vmem:[#allocation5 + $0x18] sm:$0xff] }
 0x1d0   : > { %2324 = vmatpush3.msra.mxu0 %v1363_v3  ;;  %2339 = vmatprep.subr.mxu1 %v1514_v11  ;;  %v1328_v20 = vld [vmem:[#allocation4 + $0x28] sm:$0xff]  ;;  %v1329_v23 = vld [vmem:[#allocation4 + $0x30] sm:$0xff]  ;;  %v1343_v28 = vld [vmem:[#allocation5 + $0x20] sm:$0xff]  ;;  %v1350_v32 = vmul.f32 %v1342_v26, %v1318_v6 }
 0x1d1   : > { %2326 = vmatmul.mubr.msk.f32.vlgmr.msra.gmra.mxu0 %vm1157_vm1, %v1332_v4  ;;  %2340 = vmatpush3.msra.mxu1 %v1514_v11  ;;  %v1336_v27 = vmul.f32 %v1328_v20, %v1320_v19  ;;  %v1337_v29 = vmul.f32 %v1329_v23, %v1321_v22  ;;  %v1322_v30 = vld [vmem:[%s3079_s27 + $0x38] sm:$0xff]  ;;  %v1351_v33 = vmul.f32 %v1343_v28, %v1319_v9  ;;  %v1344_v34 = vld [vmem:[#allocation5 + $0x28] sm:$0xff]  ;;  %v1345_v36 = vld [vmem:[#allocation5 + $0x30] sm:$0xff] }
 0x1d2   : > { %2328 = vmatprep.mubr.msk.f32.mxu0 %vm1157_vm1, %v1333_v5  ;;  %2341 = vmatprep.subr.mxu1 %v1513_v12  ;;  %v1330_v31 = vld [vmem:[#allocation4 + $0x38] sm:$0xff]  ;;  %v1352_v37 = vmul.f32 %v1344_v34, %v1320_v19  ;;  %v1353_v38 = vmul.f32 %v1345_v36, %v1321_v22  ;;  %v1356_v41 = vld [vmem:[#allocation2] sm:$0xff]  ;;  %v1355_v43 = vld [vmem:[#allocation2 + $0x30] sm:$0xff] }
 0x1d3   : > { %2345 = vmatprep.mubr.msk.f32.mxu1 %vm1157_vm1, %v1347_v16  ;;  %2342 = vmatpush3.msra.mxu1 %v1513_v12  ;;  %v1338_v35 = vmul.f32 %v1330_v31, %v1322_v30  ;;  %v1346_v39 = vld [vmem:[#allocation5 + $0x38] sm:$0xff]  ;;  %v1358_v46 = vld [vmem:[#allocation2 + $0x10] sm:$0xff]  ;;  %v1360_v54 = vld [vmem:[#allocation2 + $0x20] sm:$0xff] }
 0x1d4   : > { %2343 = vmatprep.subr.mxu1 %v1512_v21  ;;  %v1354_v40 = vmul.f32 %v1346_v39, %v1322_v30  ;;  %v1357_v50 = vld [vmem:[#allocation2 + $0x18] sm:$0xff]  ;;  %v1359_v58 = vld [vmem:[#allocation2 + $0x8] sm:$0xff] }
 0x1d5   : > { %2329 = vmatmul.mubr.msk.f32.gmra.mxu0 %vm1157_vm1, %v1334_v15  ;;  %2344 = vmatpush3.msra.mxu1 %v1512_v21  ;;  %v1362_v62 = vld [vmem:[#allocation2 + $0x38] sm:$0xff]  ;;  %v1361_v2 = vld [vmem:[#allocation2 + $0x28] sm:$0xff] }
 0x1d6   : > { %2331 = vmatprep.mubr.msk.f32.mxu0 %vm1157_vm1, %v1335_v18  ;;  %2346 = vmatmul.mubr.msk.f32.vlgmr.msra.gmra.mxu1 %vm1157_vm1, %v1348_v24 }
 0x1d7   : > { %2348 = vmatprep.mubr.msk.f32.mxu1 %vm1157_vm1, %v1349_v25  ;;  %v1505_v25 = vld [vmem:[#allocation3 + $0x18] sm:$0xff] }
 0x1d9   : > { %2332 = vmatmul.mubr.msk.f32.gmra.mxu0 %vm1157_vm1, %v1336_v27 }
 0x1da   : > { %2334 = vmatprep.mubr.msk.f32.mxu0 %vm1157_vm1, %v1337_v29  ;;  %2349 = vmatmul.mubr.msk.f32.gmra.mxu1 %vm1157_vm1, %v1350_v32  ;;  %v1504_v32 = vld [vmem:[#allocation3] sm:$0xff] }
 0x1db   : > { %2351 = vmatprep.mubr.msk.f32.mxu1 %vm1157_vm1, %v1351_v33  ;;  %v1507_v33 = vld [vmem:[#allocation3 + $0x20] sm:$0xff] }
 0x1dd   : > { %2335 = vmatmul.mubr.msk.f32.gmra.mxu0 %vm1157_vm1, %v1338_v35 }
 0x1de   : > { %2352 = vmatmul.mubr.msk.f32.gmra.mxu1 %vm1157_vm1, %v1352_v37 }
 0x1df   : > { %2354 = vmatprep.mubr.msk.f32.mxu1 %vm1157_vm1, %v1353_v38 }
 0x1e2   : > { %2355 = vmatmul.mubr.msk.f32.gmra.mxu1 %vm1157_vm1, %v1354_v40 }
 0x291   : > { %v2327_v42 = vpop.f32.mrf.mxu0 }
 0x292   : > { %v3249_v44 = vadd.f32 %v2327_v42, %v1356_v41  ;;  %v1506_v42 = vld [vmem:[#allocation3 + $0x10] sm:$0xff] }
 0x293   : > { %v1457_v45 = vpop.f32.mrf.mxu0 }
 0x294   : > { %v2004_v47 = vmul.f32 -1.442695, %v3249_v44  ;;  %v3252_v48 = vadd.f32 %v1457_v45, %v1355_v43  ;;  %v1509_v43 = vld [vmem:[#allocation3 + $0x8] sm:$0xff] }
 0x295   : > { %v2330_v49 = vpop.f32.mrf.mxu0 }
 0x296   : > { %2511 = vpow2.f32 %v2004_v47  ;;  %v2003_v51 = vmul.f32 -1.442695, %v3252_v48  ;;  %v3255_v52 = vadd.f32 %v2330_v49, %v1358_v46  ;;  %v2347_v10 = vpop.f32.mrf.mxu1 }
 0x297   : > { %v1467_v53 = vpop.f32.mrf.mxu0  ;;  %v1646_v30 = vadd.f32 %v2347_v10, %v1505_v25 }
 0x298   : > { %2513 = vpow2.f32 %v2003_v51  ;;  %v2006_v55 = vmul.f32 -1.442695, %v3255_v52  ;;  %v3258_v56 = vadd.f32 %v1467_v53, %v1357_v50  ;;  %v1606_v15 = vpop.f32.mrf.mxu1 }
 0x299   : > { %v2333_v57 = vpop.f32.mrf.mxu0  ;;  %v1645_v39 = vadd.f32 %v1606_v15, %v1504_v32 }
 0x29a   : > { %2515 = vpow2.f32 %v2006_v55  ;;  %v2005_v59 = vmul.f32 -1.442695, %v3258_v56  ;;  %v3261_v60 = vadd.f32 %v2333_v57, %v1360_v54  ;;  %v2350_v20 = vpop.f32.mrf.mxu1  ;;  %v1508_v54 = vld [vmem:[#allocation3 + $0x28] sm:$0xff]  ;;  %v1511_v55 = vld [vmem:[#allocation3 + $0x38] sm:$0xff] }
 0x29b   : > { %v1477_v61 = vpop.f32.mrf.mxu0  ;;  %v1648_v40 = vadd.f32 %v2350_v20, %v1507_v33 }
 0x29c   : > { %2517 = vpow2.f32 %v2005_v59  ;;  %v2008_v63 = vmul.f32 -1.442695, %v3261_v60  ;;  %v3264_v0 = vadd.f32 %v1477_v61, %v1359_v58  ;;  %v1616_v26 = vpop.f32.mrf.mxu1 }
 0x29d   : > { %v2336_v1 = vpop.f32.mrf.mxu0  ;;  %v1647_v51 = vadd.f32 %v1616_v26, %v1506_v42 }
 0x29e   : > { %2519 = vpow2.f32 %v2008_v63  ;;  %v2007_v3 = vmul.f32 -1.442695, %v3264_v0  ;;  %v3267_v4 = vadd.f32 %v2336_v1, %v1362_v62  ;;  %v2353_v34 = vpop.f32.mrf.mxu1 }
 0x29f   : > { %v1487_v5 = vpop.f32.mrf.mxu0 }
 0x2a0   : > { %2521 = vpow2.f32 %v2007_v3  ;;  %v2010_v6 = vmul.f32 -1.442695, %v3267_v4  ;;  %v3270_v7 = vadd.f32 %v1487_v5, %v1361_v2  ;;  %v1626_v45 = vpop.f32.mrf.mxu1  ;;  %v1510_v2 = vld [vmem:[#allocation3 + $0x30] sm:$0xff] }
 0x2a1   : > { %v1649_v62 = vadd.f32 %v1626_v45, %v1508_v54 }
 0x2a2   : > { %2523 = vpow2.f32 %v2010_v6  ;;  %v2009_v8 = vmul.f32 -1.442695, %v3270_v7  ;;  %v2356_v57 = vpop.f32.mrf.mxu1 }
 0x2a3   : > { %v2512_v9 = vpop.eup %2511  ;;  %v1652_v63 = vadd.f32 %v2356_v57, %v1511_v55 }
 0x2a4   : > { %v1678_v11 = vadd.f32 1.0, %v2512_v9  ;;  %2525 = vpow2.f32 %v2009_v8  ;;  %v1636_v3 = vpop.f32.mrf.mxu1 }
 0x2a5   : > { %v2514_v12 = vpop.eup %2513  ;;  %v1651_v10 = vadd.f32 %v1636_v3, %v1510_v2 }
 0x2a6   : > { %2527 = vrcp.f32 %v1678_v11  ;;  %v1677_v13 = vadd.f32 1.0, %v2514_v12 }
 0x2a7   : > { %v2516_v14 = vpop.eup %2515 }
 0x2a8   : > { %2529 = vrcp.f32 %v1677_v13  ;;  %v1680_v16 = vadd.f32 1.0, %v2516_v14 }
 0x2a9   : > { %v2518_v17 = vpop.eup %2517 }
 0x2aa   : > { %2531 = vrcp.f32 %v1680_v16  ;;  %v1679_v18 = vadd.f32 1.0, %v2518_v17 }
 0x2ab   : > { %v2520_v19 = vpop.eup %2519 }
 0x2ac   : > { %2533 = vrcp.f32 %v1679_v18  ;;  %v1682_v21 = vadd.f32 1.0, %v2520_v19 }
 0x2ad   : > { %v2522_v22 = vpop.eup %2521 }
 0x2ae   : > { %2535 = vrcp.f32 %v1682_v21  ;;  %v1681_v23 = vadd.f32 1.0, %v2522_v22 }
 0x2af   : > { %v2524_v24 = vpop.eup %2523 }
 0x2b0   : > { %2537 = vrcp.f32 %v1681_v23  ;;  %v1684_v27 = vadd.f32 1.0, %v2524_v24 }
 0x2b1   : > { %v2526_v28 = vpop.eup %2525 }
 0x2b2   : > { %2539 = vrcp.f32 %v1684_v27  ;;  %v1683_v29 = vadd.f32 1.0, %v2526_v28 }
 0x2b3   : > { %v2528_v31 = vpop.eup %2527 }
 0x2b4   : > { %v1702_v35 = vmul.f32 %v2528_v31, %v3249_v44  ;;  %2541 = vrcp.f32 %v1683_v29 }
 0x2b5   : > { %v2530_v36 = vpop.eup %2529 }
 0x2b6   : > { %v1701_v37 = vmul.f32 %v2530_v36, %v3252_v48  ;;  %v1710_v38 = vmul.f32 %v1702_v35, %v1646_v30  ;;  %v1650_v48 = vadd.f32 %v2353_v34, %v1509_v43 }
 0x2b7   : > { %v2532_v41 = vpop.eup %2531 }
 0x2b8   : > { %v1704_v46 = vmul.f32 %v2532_v41, %v3255_v52  ;;  %1718 = vst [vmem:[%s3085_s15 + $0x8] sm:$0xff] %v1710_v38  ;;  %v1709_v47 = vmul.f32 %v1701_v37, %v1645_v39 }
 0x2b9   : > { %v2534_v49 = vpop.eup %2533 }
 0x2ba   : > { %v1703_v44 = vmul.f32 %v2534_v49, %v3258_v56  ;;  %1717 = vst [vmem:[%s3085_s15] sm:$0xff] %v1709_v47  ;;  %v1712_v50 = vmul.f32 %v1704_v46, %v1648_v40 }
 0x2bb   : > { %v2536_v53 = vpop.eup %2535 }
 0x2bc   : > { %v1706_v58 = vmul.f32 %v2536_v53, %v3261_v60  ;;  %1720 = vst [vmem:[%s3085_s15 + $0x18] sm:$0xff] %v1712_v50  ;;  %v1711_v52 = vmul.f32 %v1703_v44, %v1647_v51 }
 0x2bd   : > { %v2538_v59 = vpop.eup %2537 }
 0x2be   : > { %v1705_v61 = vmul.f32 %v2538_v59, %v3264_v0  ;;  %1719 = vst [vmem:[%s3085_s15 + $0x10] sm:$0xff] %v1711_v52  ;;  %v1714_v56 = vmul.f32 %v1706_v58, %v1650_v48 }
 0x2bf   : > { %v2540_v1 = vpop.eup %2539 }
 0x2c0   : > { %v1708_v5 = vmul.f32 %v2540_v1, %v3267_v4  ;;  %1722 = vst [vmem:[%s3085_s15 + $0x28] sm:$0xff] %v1714_v56  ;;  %v1713_v6 = vmul.f32 %v1705_v61, %v1649_v62 }
 0x2c1   : > { %v2542_v60 = vpop.eup %2541 }
 0x2c2   : > { %v1707_v8 = vmul.f32 %v2542_v60, %v3270_v7  ;;  %1721 = vst [vmem:[%s3085_s15 + $0x20] sm:$0xff] %v1713_v6  ;;  %v1716_v9 = vmul.f32 %v1708_v5, %v1652_v63 }
 0x2c4   : > { %1724 = vst [vmem:[%s3085_s15 + $0x38] sm:$0xff] %v1716_v9  ;;  %v1715_v0 = vmul.f32 %v1707_v8, %v1651_v10 }
 0x2c6   : > { %1723 = vst [vmem:[%s3085_s15 + $0x30] sm:$0xff] %v1715_v0 }
 0x2c7 PF: > { %s3456_s2 = sld [smem:[#allocation25_spill]]  ;;  %s1741_s27 = sshll.u32 %s3085_s15, 4  ;;  %s3292_s27 = int_to_ptr.vmem [resolvable:$true] %s1741_s27 }
 0x2c8   : > { %s3457_s1 = sld [smem:[#allocation24_spill]]  ;;  %s3459_s17 = sand.u32 1, %s2707_s28  }
 0x2c9   : > { %s3458_s22 = sld [smem:[#allocation43_spill]]  ;;  %s3301_s26 = scalar_lea.sflag [#allocation9], %s3459_s17 }
 0x2ca   : > { %s2595_s23 = scalar_lea.vmem %s3292_s27, 1024  ;;  %s2775_s8 = smov [#allocation14]  }
 0x2cb   : > { %p2596_p4 = scmp.ne.s32.totalorder %s3292_s27, %s2595_s23  ;;  %s2599_s14 = sshll.u32 %s2775_s8, 4  ;;  %s2600_s14 = int_to_ptr.vmem [resolvable:$false] %s2599_s14 }
 0x2cc   : > { %s2601_s12 = scalar_lea.vmem %s2600_s14, 2048  ;;  %p2602_p3 = scmp.lt.s32.totalorder %s3292_s27, %s2600_s14 }
 0x2cd   : > { %s2020_s7 = sshll.u32 %s3456_s2, 5  ;;  %p2597_p12 = pnand %p2596_p4, %p2981_p8 }
 0x2ce   : > { %s1738_s13 = sadd.s32 %s3457_s1, %s2020_s7  ;;  %p2603_p5 = scmp.lt.s32.totalorder %s2601_s12, %s2595_s23 }
 0x2cf   : > { %s2014_s24 = sshll.u32 %s1738_s13, 7  ;;  %p2598_p0 = pneg %p2597_p12 }
 0x2d0   : > { %s3297_s25 = scalar_lea.hbm %s3458_s22, %s2014_s24  ;;  %p2604_p6 = por %p2603_p5, %p2602_p3 }
 0x2d2   : > { %p2605_p1 = pnand %p2604_p6, %p2598_p0 }
 0x2d4   : > { %2608 = shalt.err (!%p2605_p1)
}
 0x2d5   : > { %s2609_s30 = scalar_lea.hbm %s3297_s25, 1024  ;;  %s2613_s11 = scalar_lea.hbm %s3458_s22, 8192 }
 0x2d6   : > { %p2610_p7 = scmp.ne.s32.totalorder %s3297_s25, %s2609_s30  ;;  %p2614_p13 = scmp.lt.s32.totalorder %s3297_s25, %s3458_s22 }
 0x2d7   : > { %p2615_p2 = scmp.lt.s32.totalorder %s2613_s11, %s2609_s30 }
 0x2d8   : > { %p2611_p9 = pnand %p2610_p7, %p2981_p8 }
 0x2d9   : > { %p2616_p4 = por %p2615_p2, %p2614_p13 }
 0x2da   : > { %p2612_p10 = pneg %p2611_p9 }
 0x2dc   : > { %p2617_p12 = pnand %p2616_p4, %p2612_p10 }
 0x2de   : > { %2620 = shalt.err (!%p2617_p12)
}
 0x2df   : > { %s2776_s15 = smov 128   ;;  %s2777_s20 = smov 512  }
 0x2e0   : > { %s2778_s2 = smov 8  }
 0x2e1   : > { %2361 = dma.vmem_to_hbm [thread:$0]  (%p2981_p8), %s3292_s27, 1024, %s3297_s25, %s3301_s26, %s2776_s15, %s2777_s20, %s2778_s2  }
 0x2e2 PF: > { %s3460_s1 = sld [smem:[#allocation18_spill]]  ;;  %p2367_p0 = scmp.ge.s32.totalorder %s2767_s21, 2 }
 0x2e4   : > { %p2364_p3 = pnand %p2367_p0, %p2989_p11 }
 0x2e6   : > { %p2365_p5 = pneg %p2364_p3 }
 0x2e8   : > { %s1756_s13 = sand.u32 1, %s3460_s1  }
 0x2e9   : > { %s1757_s24 = scalar_lea.sflag [#allocation9], %s1756_s13 }
 0x2ea   : > { %2698 = dma.done.wait (%p2365_p5), %s1757_s24, 1024  }
 0x2eb   : > { %2700 = vsyncadd (%p2365_p5), %s1757_s24, 4294966272  ;;  %s27_s21 = sadd.s32 1, %s2767_s21   ;;  %s3463_s4 = sld [smem:[#allocation19_spill]] }
 0x2ec   : > { %p3329_p6 = scmp.ge.s32.totalorder %s27_s21, 18   ;;  %s3464_s29 = sld [smem:[#allocation35_spill]] }
 0x2ed   : > { %s3465_s3 = sld [smem:[#allocation34_spill]]  ;;  %s3476_s27 = smov %s2707_s28 }
 0x2ee   : > { %s3466_s25 = sld [smem:[#allocation20_spill]]  ;;  %s3479_s30 = smov %s2719_s9 }
 0x2ef   : > { %s3467_s11 = sld [smem:[#allocation21_spill]]  ;;  %s3482_s16 = smov %s2759_s19 }
 0x2f0   : > { %s3468_s12 = sld [smem:[#allocation31_spill]] }
 0x2f1   : > { %s3469_s13 = sld [smem:[#allocation22_spill]]  ;;  %s3477_s28 = smov %s3463_s4 }
 0x2f2   : > { %s3470_s14 = sld [smem:[#allocation33_spill]] }
 0x2f3   : > { %s3471_s15 = sld [smem:[#allocation26_spill]]  ;;  %s3480_s9 = smov %s3465_s3 }
 0x2f4   : > { %s3472_s17 = sld [smem:[#allocation27_spill]]  ;;  %s3481_s10 = smov %s3466_s25 }
 0x2f5   : > { %s3473_s18 = sld [smem:[#allocation28_spill]] }
 0x2f6   : > { %s3474_s26 = sld [smem:[#allocation29_spill]] }
 0x2f7   : > { %s3475_s20 = sld [smem:[#allocation30_spill]] }
 0x2f8   :  { %26 = sbr.rel (!%p3329_p6) target bundleno = 22 (0x16), region = 265 }
 0x2fc   : > { %s3483_s19 = smov %s3474_s26 }
 0x2fd   :  { %1762 = vsyncpa [#allocation8], 1 }
 0x2fe   :  { %1764 = vsyncpa [#allocation8 + $0x1], 1 }
 0x2ff   :  { %1765 = vsyncpa [#allocation11], 1 }
 0x300   :  { %1767 = vsyncpa [#allocation11 + $0x1], 1 }
 0x301   :  { %1768 = vsyncpa [#allocation9], 1 }
 0x302   :  { %1770 = vsyncpa [#allocation9 + $0x1], 1 }

</bundles_post_ra>
